<compile_context>
chip_gen: v7x
topology: tpu7x:2x2x1
jax: 0.10.0
libtpu: 0.0.40
codegen_flags: <defaults>
</compile_context>

<pallas_src>
import jax
import jax.numpy as jnp
from jax.experimental import pallas as pl
from jax.experimental.pallas import tpu as pltpu

FEAT = 2          # env.feat = mv + pv + dev = 1 + 1 + 0
H1 = 64           # first LSTM hidden size
H2 = 32           # second LSTM hidden size
GP = 128          # per-gate lane block (vreg lane width); H1 + H2 = 96 <= GP
GP4 = 4 * GP      # packed 4-gate width (512)
ACTION_DIM = 1    # env.action_space.shape[0]
MAX_ACTION = 1.0  # upper_bound


def _actor_kernel(x_ref,       # (T, B, FEAT) f32
                  w1i_ref,     # (FEAT, GP4)  f32   W1_ih^T, lanes 0..H1-1 per gate block
                  b1_ref,      # (1, GP4)     f32   b1 (ih+hh), lanes 0..H1-1 per block
                  wrec_ref,    # (GP, GP4)    bf16  [[W1h, W2i],[0, W2h]] lane-packed
                  b2_ref,      # (1, GP4)     f32   b2 (ih+hh), lanes H1..H1+H2-1 per block
                  w3_ref,      # (1, GP)      f32   W3^T at lanes H1..H1+H2-1
                  b3_ref,      # (1, ACTION_DIM) f32
                  out_ref):    # (B, ACTION_DIM) f32
    T, B, _ = x_ref.shape
    wrec = wrec_ref[...]

    # ---- hoisted LSTM1 input projection (off the serial chain) ----
    # FEAT == 2: two VPU broadcast-FMAs instead of tiny MXU matmuls.
    xw = (x_ref[:, :, 0:1] * w1i_ref[0:1, :]
          + x_ref[:, :, 1:2] * w1i_ref[1:2, :])            # (T, B, GP4)
    g0 = xw[0] + b1_ref[...]                               # LSTM1 gates at t=0
    xpb = xw + (b1_ref[...] + b2_ref[...])                 # per-step bias folded in

    def gate_act(gates, c):
        # PyTorch gate order (i, f, g, o); each gate owns its own 128-lane
        # block with LSTM1 in lanes 0..63 and LSTM2 in lanes 64..95, so a
        # single pass updates both cells.  Padded lanes stay exactly zero.
        i_g = jax.nn.sigmoid(gates[:, 0 * GP:1 * GP])
        f_g = jax.nn.sigmoid(gates[:, 1 * GP:2 * GP])
        g_g = jnp.tanh(gates[:, 2 * GP:3 * GP])
        o_g = jax.nn.sigmoid(gates[:, 3 * GP:4 * GP])
        c_new = f_g * c + i_g * g_g
        h_new = o_g * jnp.tanh(c_new)
        return h_new, c_new

    # Prologue: LSTM1 step 0 (h1_{-1}=0).  The LSTM2 lanes see all-zero
    # pre-activations, so they stay at the h2_{-1}=c2_{-1}=0 initial state.
    h, c = gate_act(g0, jnp.zeros((B, GP), jnp.float32))

    # Skewed main loop: ONE fused bf16 matmul per step.  After iteration i the
    # gate1 lanes of h hold h1_i and the gate2 lanes hold h2_{i-1}.
    # TODO(synk): for long sequences switch to lax.fori_loop(..., unroll=4)
    # and stream xw per T-chunk so the hoisted projection stays inside v7x's
    # 64 MiB VMEM; full static unroll is only for small T (known at trace).
    for i in range(1, T):
        rec = jnp.dot(h.astype(jnp.bfloat16), wrec,
                      preferred_element_type=jnp.float32)   # (B, GP4)
        h, c = gate_act(rec + xpb[i], c)

    # Final half-step: advance only LSTM2 to get h2_{T-1}.  The gate1 lanes
    # produce unused values; they are masked out by the zero lanes of w3.
    rec = jnp.dot(h.astype(jnp.bfloat16), wrec,
                  preferred_element_type=jnp.float32)
    h, _ = gate_act(rec + b2_ref[...], c)

    # Linear(32 -> 1) as VPU multiply + XLU lane reduction (no MXU load).
    af = jnp.sum(h * w3_ref[...], axis=-1, keepdims=True) + b3_ref[...]
    out_ref[...] = (MAX_ACTION * jax.nn.sigmoid(af)).astype(out_ref.dtype)


def _scatter_gates(w, h, offset):
    """(..., 4*h) -> (..., 4*GP): gate g lands at lanes [g*GP+offset, +h)."""
    out = jnp.zeros(w.shape[:-1] + (GP4,), jnp.float32)
    for g in range(4):
        out = out.at[..., g * GP + offset:g * GP + offset + h].set(
            w[..., g * h:(g + 1) * h])
    return out


def prepare_params(params):
    """Convert standard (pre-transposed, bias-folded) params to the lane-packed,
    layer-skewed layout the kernel consumes.  Done once, outside the kernel."""
    (w1i, w1h, b1, w2i, w2h, b2, w3, b3) = params
    w1i_p = _scatter_gates(w1i, H1, 0)                     # (FEAT, GP4)
    b1_p = _scatter_gates(b1, H1, 0)                       # (1, GP4)
    b2_p = _scatter_gates(b2, H2, H1)                      # (1, GP4)

    # Fused, lane-packed, layer-skewed recurrent weight (stored bf16):
    #   rows 0..H1-1      : [ W1h | W2i ]   (multiplies h1_t)
    #   rows H1..H1+H2-1  : [  0  | W2h ]   (multiplies h2_{t-1})
    wrec = jnp.zeros((GP, GP4), jnp.float32)
    wrec = wrec.at[:H1, :].set(_scatter_gates(w1h, H1, 0)
                               + _scatter_gates(w2i, H2, H1))
    wrec = wrec.at[H1:H1 + H2, :].set(_scatter_gates(w2h, H2, H1))
    wrec = wrec.astype(jnp.bfloat16)

    # Final linear as a single broadcast row (ACTION_DIM == 1).
    w3_p = jnp.zeros((1, GP), jnp.float32).at[0, H1:H1 + H2].set(w3[:, 0])
    return (w1i_p, b1_p, wrec, b2_p, w3_p, b3)


@jax.jit
def actor_forward(state_btf, prepped):
    """state_btf: (B, T, FEAT) float32, like the PyTorch batch_first input.
    prepped: output of prepare_params()."""
    B = state_btf.shape[0]
    x_tbf = jnp.transpose(state_btf, (1, 0, 2))            # (T, B, FEAT)

    vmem = pltpu.MemorySpace.VMEM
    full = lambda: pl.BlockSpec(memory_space=vmem)

    # NOTE: B is tiny here; for production batch sizes pad B to a multiple of 8
    # and add a leading batch grid axis with dimension_semantics=("parallel",)
    # so both v7x TensorCores are used.
    return pl.pallas_call(
        _actor_kernel,
        out_shape=jax.ShapeDtypeStruct((B, ACTION_DIM), jnp.float32),
        in_specs=[full() for _ in range(7)],
        out_specs=full(),
    )(x_tbf, *prepped)


def init_params(key):
    """Deterministic init matching the PyTorch parameter shapes.
    Weights are stored pre-transposed (in_dim, out_dim); LSTM biases are the
    sum b_ih + b_hh folded into a single (1, 4H) row."""
    ks = jax.random.split(key, 12)
    k1 = 1.0 / jnp.sqrt(H1)
    k2 = 1.0 / jnp.sqrt(H2)

    def u(k, shape, scale):
        return jax.random.uniform(k, shape, jnp.float32, -scale, scale)

    w1i = u(ks[0], (FEAT, 4 * H1), k1)
    w1h = u(ks[1], (H1, 4 * H1), k1)
    b1 = u(ks[2], (1, 4 * H1), k1) + u(ks[3], (1, 4 * H1), k1)
    w2i = u(ks[4], (H1, 4 * H2), k2)
    w2h = u(ks[5], (H2, 4 * H2), k2)
    b2 = u(ks[6], (1, 4 * H2), k2) + u(ks[7], (1, 4 * H2), k2)
    w3 = u(ks[8], (H2, ACTION_DIM), k2)
    b3 = u(ks[9], (1, ACTION_DIM), k2)
    return (w1i, w1h, b1, w2i, w2h, b2, w3, b3)


def actor_reference(state_btf, params):
    """Pure-JAX reference (no Pallas, unfused/unpadded/f32) for correctness."""
    (w1i, w1h, b1, w2i, w2h, b2, w3, b3) = params
    B, T, _ = state_btf.shape

    def cell(x_t, h, c, wi, wh, b, hid):
        g = x_t @ wi + h @ wh + b
        i = jax.nn.sigmoid(g[:, :hid])
        f = jax.nn.sigmoid(g[:, hid:2 * hid])
        gg = jnp.tanh(g[:, 2 * hid:3 * hid])
        o = jax.nn.sigmoid(g[:, 3 * hid:])
        c = f * c + i * gg
        h = o * jnp.tanh(c)
        return h, c

    h1 = jnp.zeros((B, H1)); c1 = jnp.zeros((B, H1))
    h2 = jnp.zeros((B, H2)); c2 = jnp.zeros((B, H2))
    for t in range(T):
        h1, c1 = cell(state_btf[:, t, :], h1, c1, w1i, w1h, b1, H1)
        h2, c2 = cell(h1, h2, c2, w2i, w2h, b2, H2)
    return MAX_ACTION * jax.nn.sigmoid(h2 @ w3 + b3)


if __name__ == "__main__":
    key = jax.random.PRNGKey(0)
    k_params, k_x = jax.random.split(key)

    params = init_params(k_params)
    prepped = prepare_params(params)

    B, T = 2, 8
    state = jax.random.normal(k_x, (B, T, FEAT), jnp.float32)

    out = actor_forward(state, prepped)
    out = jax.block_until_ready(out)

    ref = actor_reference(state, params)
    assert out.shape == (B, ACTION_DIM)
    # Recurrent weights are bf16 in the kernel -> loosened tolerance vs f32 ref.
    assert jnp.allclose(out, ref, atol=2e-2, rtol=2e-2), (out, ref)

    print("KERNEL_OK")
</pallas_src>

<mosaic_0001>
module attributes {stable_mosaic.version = 11 : i64} {
  func.func @_actor_kernel(%arg0: memref<8x2x2xf32, #tpu.memory_space<vmem>>, %arg1: memref<2x512xf32, #tpu.memory_space<vmem>>, %arg2: memref<1x512xf32, #tpu.memory_space<vmem>>, %arg3: memref<128x512xbf16, #tpu.memory_space<vmem>>, %arg4: memref<1x512xf32, #tpu.memory_space<vmem>>, %arg5: memref<1x128xf32, #tpu.memory_space<vmem>>, %arg6: memref<1x1xf32, #tpu.memory_space<vmem>>, %arg7: memref<2x1xf32, #tpu.memory_space<vmem>>) attributes {dimension_semantics = [], scalar_prefetch = 0 : i64, scratch_operands = 0 : i64, tpu.core_type = #tpu.core_type<tc>} {
    %c0 = arith.constant 0 : index
    %c0_0 = arith.constant 0 : index
    %0 = vector.load %arg3[%c0, %c0_0] : memref<128x512xbf16, #tpu.memory_space<vmem>>, vector<128x512xbf16>
    %c0_1 = arith.constant 0 : index
    %c0_2 = arith.constant 0 : index
    %c0_3 = arith.constant 0 : index
    %1 = vector.load %arg0[%c0_1, %c0_2, %c0_3] : memref<8x2x2xf32, #tpu.memory_space<vmem>>, vector<8x2x1xf32>
    %c0_4 = arith.constant 0 : index
    %c0_5 = arith.constant 0 : index
    %2 = vector.load %arg1[%c0_4, %c0_5] : memref<2x512xf32, #tpu.memory_space<vmem>>, vector<1x512xf32>
    %3 = vector.shape_cast %2 : vector<1x512xf32> to vector<1x1x512xf32>
    %4 = vector.broadcast %1 : vector<8x2x1xf32> to vector<8x2x512xf32>
    %5 = vector.broadcast %3 : vector<1x1x512xf32> to vector<8x2x512xf32>
    %6 = arith.mulf %4, %5 : vector<8x2x512xf32>
    %c0_6 = arith.constant 0 : index
    %c0_7 = arith.constant 0 : index
    %c1 = arith.constant 1 : index
    %7 = vector.load %arg0[%c0_6, %c0_7, %c1] : memref<8x2x2xf32, #tpu.memory_space<vmem>>, vector<8x2x1xf32>
    %c1_8 = arith.constant 1 : index
    %c0_9 = arith.constant 0 : index
    %8 = vector.load %arg1[%c1_8, %c0_9] : memref<2x512xf32, #tpu.memory_space<vmem>>, vector<1x512xf32>
    %9 = vector.shape_cast %8 : vector<1x512xf32> to vector<1x1x512xf32>
    %10 = vector.broadcast %7 : vector<8x2x1xf32> to vector<8x2x512xf32>
    %11 = vector.broadcast %9 : vector<1x1x512xf32> to vector<8x2x512xf32>
    %12 = arith.mulf %10, %11 : vector<8x2x512xf32>
    %13 = arith.addf %6, %12 : vector<8x2x512xf32>
    %14 = vector.extract_strided_slice %13 {offsets = [0, 0, 0], sizes = [1, 2, 512], strides = [1, 1, 1]} : vector<8x2x512xf32> to vector<1x2x512xf32>
    %15 = vector.shape_cast %14 : vector<1x2x512xf32> to vector<2x512xf32>
    %c0_10 = arith.constant 0 : index
    %c0_11 = arith.constant 0 : index
    %16 = vector.load %arg2[%c0_10, %c0_11] : memref<1x512xf32, #tpu.memory_space<vmem>>, vector<1x512xf32>
    %17 = vector.broadcast %16 : vector<1x512xf32> to vector<2x512xf32>
    %18 = arith.addf %15, %17 : vector<2x512xf32>
    %c0_12 = arith.constant 0 : index
    %c0_13 = arith.constant 0 : index
    %19 = vector.load %arg2[%c0_12, %c0_13] : memref<1x512xf32, #tpu.memory_space<vmem>>, vector<1x512xf32>
    %c0_14 = arith.constant 0 : index
    %c0_15 = arith.constant 0 : index
    %20 = vector.load %arg4[%c0_14, %c0_15] : memref<1x512xf32, #tpu.memory_space<vmem>>, vector<1x512xf32>
    %21 = arith.addf %19, %20 : vector<1x512xf32>
    %22 = vector.shape_cast %21 : vector<1x512xf32> to vector<1x1x512xf32>
    %23 = vector.broadcast %22 : vector<1x1x512xf32> to vector<8x2x512xf32>
    %24 = arith.addf %13, %23 : vector<8x2x512xf32>
    %cst = arith.constant 0.000000e+00 : f32
    %25 = vector.broadcast %cst : f32 to vector<2x128xf32>
    %26 = vector.extract_strided_slice %18 {offsets = [0, 0], sizes = [2, 128], strides = [1, 1]} : vector<2x512xf32> to vector<2x128xf32>
    %27 = arith.negf %26 : vector<2x128xf32>
    %28 = math.exp %27 : vector<2x128xf32>
    %cst_16 = arith.constant 1.000000e+00 : f32
    %29 = vector.broadcast %cst_16 : f32 to vector<2x128xf32>
    %30 = arith.addf %29, %28 : vector<2x128xf32>
    %31 = arith.divf %29, %30 : vector<2x128xf32>
    %32 = vector.extract_strided_slice %18 {offsets = [0, 128], sizes = [2, 128], strides = [1, 1]} : vector<2x512xf32> to vector<2x128xf32>
    %33 = arith.negf %32 : vector<2x128xf32>
    %34 = math.exp %33 : vector<2x128xf32>
    %cst_17 = arith.constant 1.000000e+00 : f32
    %35 = vector.broadcast %cst_17 : f32 to vector<2x128xf32>
    %36 = arith.addf %35, %34 : vector<2x128xf32>
    %37 = arith.divf %35, %36 : vector<2x128xf32>
    %38 = vector.extract_strided_slice %18 {offsets = [0, 256], sizes = [2, 128], strides = [1, 1]} : vector<2x512xf32> to vector<2x128xf32>
    %39 = math.tanh %38 : vector<2x128xf32>
    %40 = vector.extract_strided_slice %18 {offsets = [0, 384], sizes = [2, 128], strides = [1, 1]} : vector<2x512xf32> to vector<2x128xf32>
    %41 = arith.negf %40 : vector<2x128xf32>
    %42 = math.exp %41 : vector<2x128xf32>
    %cst_18 = arith.constant 1.000000e+00 : f32
    %43 = vector.broadcast %cst_18 : f32 to vector<2x128xf32>
    %44 = arith.addf %43, %42 : vector<2x128xf32>
    %45 = arith.divf %43, %44 : vector<2x128xf32>
    %46 = arith.mulf %37, %25 : vector<2x128xf32>
    %47 = arith.mulf %31, %39 : vector<2x128xf32>
    %48 = arith.addf %46, %47 : vector<2x128xf32>
    %49 = math.tanh %48 : vector<2x128xf32>
    %50 = arith.mulf %45, %49 : vector<2x128xf32>
    %51 = arith.truncf %50 : vector<2x128xf32> to vector<2x128xbf16>
    %cst_19 = arith.constant dense<0.000000e+00> : vector<2x512xf32>
    %52 = tpu.matmul %51, %0, %cst_19 {dimension_numbers = #tpu.dot_dimension_numbers<[1], [0], [0], [1], [0, 0, 1, 1], [], []>} : vector<2x128xbf16>, vector<128x512xbf16>, vector<2x512xf32> -> vector<2x512xf32>
    %53 = vector.extract_strided_slice %24 {offsets = [1, 0, 0], sizes = [1, 2, 512], strides = [1, 1, 1]} : vector<8x2x512xf32> to vector<1x2x512xf32>
    %54 = vector.shape_cast %53 : vector<1x2x512xf32> to vector<2x512xf32>
    %55 = arith.addf %52, %54 : vector<2x512xf32>
    %56 = vector.extract_strided_slice %55 {offsets = [0, 0], sizes = [2, 128], strides = [1, 1]} : vector<2x512xf32> to vector<2x128xf32>
    %57 = arith.negf %56 : vector<2x128xf32>
    %58 = math.exp %57 : vector<2x128xf32>
    %cst_20 = arith.constant 1.000000e+00 : f32
    %59 = vector.broadcast %cst_20 : f32 to vector<2x128xf32>
    %60 = arith.addf %59, %58 : vector<2x128xf32>
    %61 = arith.divf %59, %60 : vector<2x128xf32>
    %62 = vector.extract_strided_slice %55 {offsets = [0, 128], sizes = [2, 128], strides = [1, 1]} : vector<2x512xf32> to vector<2x128xf32>
    %63 = arith.negf %62 : vector<2x128xf32>
    %64 = math.exp %63 : vector<2x128xf32>
    %cst_21 = arith.constant 1.000000e+00 : f32
    %65 = vector.broadcast %cst_21 : f32 to vector<2x128xf32>
    %66 = arith.addf %65, %64 : vector<2x128xf32>
    %67 = arith.divf %65, %66 : vector<2x128xf32>
    %68 = vector.extract_strided_slice %55 {offsets = [0, 256], sizes = [2, 128], strides = [1, 1]} : vector<2x512xf32> to vector<2x128xf32>
    %69 = math.tanh %68 : vector<2x128xf32>
    %70 = vector.extract_strided_slice %55 {offsets = [0, 384], sizes = [2, 128], strides = [1, 1]} : vector<2x512xf32> to vector<2x128xf32>
    %71 = arith.negf %70 : vector<2x128xf32>
    %72 = math.exp %71 : vector<2x128xf32>
    %cst_22 = arith.constant 1.000000e+00 : f32
    %73 = vector.broadcast %cst_22 : f32 to vector<2x128xf32>
    %74 = arith.addf %73, %72 : vector<2x128xf32>
    %75 = arith.divf %73, %74 : vector<2x128xf32>
    %76 = arith.mulf %67, %48 : vector<2x128xf32>
    %77 = arith.mulf %61, %69 : vector<2x128xf32>
    %78 = arith.addf %76, %77 : vector<2x128xf32>
    %79 = math.tanh %78 : vector<2x128xf32>
    %80 = arith.mulf %75, %79 : vector<2x128xf32>
    %81 = arith.truncf %80 : vector<2x128xf32> to vector<2x128xbf16>
    %cst_23 = arith.constant dense<0.000000e+00> : vector<2x512xf32>
    %82 = tpu.matmul %81, %0, %cst_23 {dimension_numbers = #tpu.dot_dimension_numbers<[1], [0], [0], [1], [0, 0, 1, 1], [], []>} : vector<2x128xbf16>, vector<128x512xbf16>, vector<2x512xf32> -> vector<2x512xf32>
    %83 = vector.extract_strided_slice %24 {offsets = [2, 0, 0], sizes = [1, 2, 512], strides = [1, 1, 1]} : vector<8x2x512xf32> to vector<1x2x512xf32>
    %84 = vector.shape_cast %83 : vector<1x2x512xf32> to vector<2x512xf32>
    %85 = arith.addf %82, %84 : vector<2x512xf32>
    %86 = vector.extract_strided_slice %85 {offsets = [0, 0], sizes = [2, 128], strides = [1, 1]} : vector<2x512xf32> to vector<2x128xf32>
    %87 = arith.negf %86 : vector<2x128xf32>
    %88 = math.exp %87 : vector<2x128xf32>
    %cst_24 = arith.constant 1.000000e+00 : f32
    %89 = vector.broadcast %cst_24 : f32 to vector<2x128xf32>
    %90 = arith.addf %89, %88 : vector<2x128xf32>
    %91 = arith.divf %89, %90 : vector<2x128xf32>
    %92 = vector.extract_strided_slice %85 {offsets = [0, 128], sizes = [2, 128], strides = [1, 1]} : vector<2x512xf32> to vector<2x128xf32>
    %93 = arith.negf %92 : vector<2x128xf32>
    %94 = math.exp %93 : vector<2x128xf32>
    %cst_25 = arith.constant 1.000000e+00 : f32
    %95 = vector.broadcast %cst_25 : f32 to vector<2x128xf32>
    %96 = arith.addf %95, %94 : vector<2x128xf32>
    %97 = arith.divf %95, %96 : vector<2x128xf32>
    %98 = vector.extract_strided_slice %85 {offsets = [0, 256], sizes = [2, 128], strides = [1, 1]} : vector<2x512xf32> to vector<2x128xf32>
    %99 = math.tanh %98 : vector<2x128xf32>
    %100 = vector.extract_strided_slice %85 {offsets = [0, 384], sizes = [2, 128], strides = [1, 1]} : vector<2x512xf32> to vector<2x128xf32>
    %101 = arith.negf %100 : vector<2x128xf32>
    %102 = math.exp %101 : vector<2x128xf32>
    %cst_26 = arith.constant 1.000000e+00 : f32
    %103 = vector.broadcast %cst_26 : f32 to vector<2x128xf32>
    %104 = arith.addf %103, %102 : vector<2x128xf32>
    %105 = arith.divf %103, %104 : vector<2x128xf32>
    %106 = arith.mulf %97, %78 : vector<2x128xf32>
    %107 = arith.mulf %91, %99 : vector<2x128xf32>
    %108 = arith.addf %106, %107 : vector<2x128xf32>
    %109 = math.tanh %108 : vector<2x128xf32>
    %110 = arith.mulf %105, %109 : vector<2x128xf32>
    %111 = arith.truncf %110 : vector<2x128xf32> to vector<2x128xbf16>
    %cst_27 = arith.constant dense<0.000000e+00> : vector<2x512xf32>
    %112 = tpu.matmul %111, %0, %cst_27 {dimension_numbers = #tpu.dot_dimension_numbers<[1], [0], [0], [1], [0, 0, 1, 1], [], []>} : vector<2x128xbf16>, vector<128x512xbf16>, vector<2x512xf32> -> vector<2x512xf32>
    %113 = vector.extract_strided_slice %24 {offsets = [3, 0, 0], sizes = [1, 2, 512], strides = [1, 1, 1]} : vector<8x2x512xf32> to vector<1x2x512xf32>
    %114 = vector.shape_cast %113 : vector<1x2x512xf32> to vector<2x512xf32>
    %115 = arith.addf %112, %114 : vector<2x512xf32>
    %116 = vector.extract_strided_slice %115 {offsets = [0, 0], sizes = [2, 128], strides = [1, 1]} : vector<2x512xf32> to vector<2x128xf32>
    %117 = arith.negf %116 : vector<2x128xf32>
    %118 = math.exp %117 : vector<2x128xf32>
    %cst_28 = arith.constant 1.000000e+00 : f32
    %119 = vector.broadcast %cst_28 : f32 to vector<2x128xf32>
    %120 = arith.addf %119, %118 : vector<2x128xf32>
    %121 = arith.divf %119, %120 : vector<2x128xf32>
    %122 = vector.extract_strided_slice %115 {offsets = [0, 128], sizes = [2, 128], strides = [1, 1]} : vector<2x512xf32> to vector<2x128xf32>
    %123 = arith.negf %122 : vector<2x128xf32>
    %124 = math.exp %123 : vector<2x128xf32>
    %cst_29 = arith.constant 1.000000e+00 : f32
    %125 = vector.broadcast %cst_29 : f32 to vector<2x128xf32>
    %126 = arith.addf %125, %124 : vector<2x128xf32>
    %127 = arith.divf %125, %126 : vector<2x128xf32>
    %128 = vector.extract_strided_slice %115 {offsets = [0, 256], sizes = [2, 128], strides = [1, 1]} : vector<2x512xf32> to vector<2x128xf32>
    %129 = math.tanh %128 : vector<2x128xf32>
    %130 = vector.extract_strided_slice %115 {offsets = [0, 384], sizes = [2, 128], strides = [1, 1]} : vector<2x512xf32> to vector<2x128xf32>
    %131 = arith.negf %130 : vector<2x128xf32>
    %132 = math.exp %131 : vector<2x128xf32>
    %cst_30 = arith.constant 1.000000e+00 : f32
    %133 = vector.broadcast %cst_30 : f32 to vector<2x128xf32>
    %134 = arith.addf %133, %132 : vector<2x128xf32>
    %135 = arith.divf %133, %134 : vector<2x128xf32>
    %136 = arith.mulf %127, %108 : vector<2x128xf32>
    %137 = arith.mulf %121, %129 : vector<2x128xf32>
    %138 = arith.addf %136, %137 : vector<2x128xf32>
    %139 = math.tanh %138 : vector<2x128xf32>
    %140 = arith.mulf %135, %139 : vector<2x128xf32>
    %141 = arith.truncf %140 : vector<2x128xf32> to vector<2x128xbf16>
    %cst_31 = arith.constant dense<0.000000e+00> : vector<2x512xf32>
    %142 = tpu.matmul %141, %0, %cst_31 {dimension_numbers = #tpu.dot_dimension_numbers<[1], [0], [0], [1], [0, 0, 1, 1], [], []>} : vector<2x128xbf16>, vector<128x512xbf16>, vector<2x512xf32> -> vector<2x512xf32>
    %143 = vector.extract_strided_slice %24 {offsets = [4, 0, 0], sizes = [1, 2, 512], strides = [1, 1, 1]} : vector<8x2x512xf32> to vector<1x2x512xf32>
    %144 = vector.shape_cast %143 : vector<1x2x512xf32> to vector<2x512xf32>
    %145 = arith.addf %142, %144 : vector<2x512xf32>
    %146 = vector.extract_strided_slice %145 {offsets = [0, 0], sizes = [2, 128], strides = [1, 1]} : vector<2x512xf32> to vector<2x128xf32>
    %147 = arith.negf %146 : vector<2x128xf32>
    %148 = math.exp %147 : vector<2x128xf32>
    %cst_32 = arith.constant 1.000000e+00 : f32
    %149 = vector.broadcast %cst_32 : f32 to vector<2x128xf32>
    %150 = arith.addf %149, %148 : vector<2x128xf32>
    %151 = arith.divf %149, %150 : vector<2x128xf32>
    %152 = vector.extract_strided_slice %145 {offsets = [0, 128], sizes = [2, 128], strides = [1, 1]} : vector<2x512xf32> to vector<2x128xf32>
    %153 = arith.negf %152 : vector<2x128xf32>
    %154 = math.exp %153 : vector<2x128xf32>
    %cst_33 = arith.constant 1.000000e+00 : f32
    %155 = vector.broadcast %cst_33 : f32 to vector<2x128xf32>
    %156 = arith.addf %155, %154 : vector<2x128xf32>
    %157 = arith.divf %155, %156 : vector<2x128xf32>
    %158 = vector.extract_strided_slice %145 {offsets = [0, 256], sizes = [2, 128], strides = [1, 1]} : vector<2x512xf32> to vector<2x128xf32>
    %159 = math.tanh %158 : vector<2x128xf32>
    %160 = vector.extract_strided_slice %145 {offsets = [0, 384], sizes = [2, 128], strides = [1, 1]} : vector<2x512xf32> to vector<2x128xf32>
    %161 = arith.negf %160 : vector<2x128xf32>
    %162 = math.exp %161 : vector<2x128xf32>
    %cst_34 = arith.constant 1.000000e+00 : f32
    %163 = vector.broadcast %cst_34 : f32 to vector<2x128xf32>
    %164 = arith.addf %163, %162 : vector<2x128xf32>
    %165 = arith.divf %163, %164 : vector<2x128xf32>
    %166 = arith.mulf %157, %138 : vector<2x128xf32>
    %167 = arith.mulf %151, %159 : vector<2x128xf32>
    %168 = arith.addf %166, %167 : vector<2x128xf32>
    %169 = math.tanh %168 : vector<2x128xf32>
    %170 = arith.mulf %165, %169 : vector<2x128xf32>
    %171 = arith.truncf %170 : vector<2x128xf32> to vector<2x128xbf16>
    %cst_35 = arith.constant dense<0.000000e+00> : vector<2x512xf32>
    %172 = tpu.matmul %171, %0, %cst_35 {dimension_numbers = #tpu.dot_dimension_numbers<[1], [0], [0], [1], [0, 0, 1, 1], [], []>} : vector<2x128xbf16>, vector<128x512xbf16>, vector<2x512xf32> -> vector<2x512xf32>
    %173 = vector.extract_strided_slice %24 {offsets = [5, 0, 0], sizes = [1, 2, 512], strides = [1, 1, 1]} : vector<8x2x512xf32> to vector<1x2x512xf32>
    %174 = vector.shape_cast %173 : vector<1x2x512xf32> to vector<2x512xf32>
    %175 = arith.addf %172, %174 : vector<2x512xf32>
    %176 = vector.extract_strided_slice %175 {offsets = [0, 0], sizes = [2, 128], strides = [1, 1]} : vector<2x512xf32> to vector<2x128xf32>
    %177 = arith.negf %176 : vector<2x128xf32>
    %178 = math.exp %177 : vector<2x128xf32>
    %cst_36 = arith.constant 1.000000e+00 : f32
    %179 = vector.broadcast %cst_36 : f32 to vector<2x128xf32>
    %180 = arith.addf %179, %178 : vector<2x128xf32>
    %181 = arith.divf %179, %180 : vector<2x128xf32>
    %182 = vector.extract_strided_slice %175 {offsets = [0, 128], sizes = [2, 128], strides = [1, 1]} : vector<2x512xf32> to vector<2x128xf32>
    %183 = arith.negf %182 : vector<2x128xf32>
    %184 = math.exp %183 : vector<2x128xf32>
    %cst_37 = arith.constant 1.000000e+00 : f32
    %185 = vector.broadcast %cst_37 : f32 to vector<2x128xf32>
    %186 = arith.addf %185, %184 : vector<2x128xf32>
    %187 = arith.divf %185, %186 : vector<2x128xf32>
    %188 = vector.extract_strided_slice %175 {offsets = [0, 256], sizes = [2, 128], strides = [1, 1]} : vector<2x512xf32> to vector<2x128xf32>
    %189 = math.tanh %188 : vector<2x128xf32>
    %190 = vector.extract_strided_slice %175 {offsets = [0, 384], sizes = [2, 128], strides = [1, 1]} : vector<2x512xf32> to vector<2x128xf32>
    %191 = arith.negf %190 : vector<2x128xf32>
    %192 = math.exp %191 : vector<2x128xf32>
    %cst_38 = arith.constant 1.000000e+00 : f32
    %193 = vector.broadcast %cst_38 : f32 to vector<2x128xf32>
    %194 = arith.addf %193, %192 : vector<2x128xf32>
    %195 = arith.divf %193, %194 : vector<2x128xf32>
    %196 = arith.mulf %187, %168 : vector<2x128xf32>
    %197 = arith.mulf %181, %189 : vector<2x128xf32>
    %198 = arith.addf %196, %197 : vector<2x128xf32>
    %199 = math.tanh %198 : vector<2x128xf32>
    %200 = arith.mulf %195, %199 : vector<2x128xf32>
    %201 = arith.truncf %200 : vector<2x128xf32> to vector<2x128xbf16>
    %cst_39 = arith.constant dense<0.000000e+00> : vector<2x512xf32>
    %202 = tpu.matmul %201, %0, %cst_39 {dimension_numbers = #tpu.dot_dimension_numbers<[1], [0], [0], [1], [0, 0, 1, 1], [], []>} : vector<2x128xbf16>, vector<128x512xbf16>, vector<2x512xf32> -> vector<2x512xf32>
    %203 = vector.extract_strided_slice %24 {offsets = [6, 0, 0], sizes = [1, 2, 512], strides = [1, 1, 1]} : vector<8x2x512xf32> to vector<1x2x512xf32>
    %204 = vector.shape_cast %203 : vector<1x2x512xf32> to vector<2x512xf32>
    %205 = arith.addf %202, %204 : vector<2x512xf32>
    %206 = vector.extract_strided_slice %205 {offsets = [0, 0], sizes = [2, 128], strides = [1, 1]} : vector<2x512xf32> to vector<2x128xf32>
    %207 = arith.negf %206 : vector<2x128xf32>
    %208 = math.exp %207 : vector<2x128xf32>
    %cst_40 = arith.constant 1.000000e+00 : f32
    %209 = vector.broadcast %cst_40 : f32 to vector<2x128xf32>
    %210 = arith.addf %209, %208 : vector<2x128xf32>
    %211 = arith.divf %209, %210 : vector<2x128xf32>
    %212 = vector.extract_strided_slice %205 {offsets = [0, 128], sizes = [2, 128], strides = [1, 1]} : vector<2x512xf32> to vector<2x128xf32>
    %213 = arith.negf %212 : vector<2x128xf32>
    %214 = math.exp %213 : vector<2x128xf32>
    %cst_41 = arith.constant 1.000000e+00 : f32
    %215 = vector.broadcast %cst_41 : f32 to vector<2x128xf32>
    %216 = arith.addf %215, %214 : vector<2x128xf32>
    %217 = arith.divf %215, %216 : vector<2x128xf32>
    %218 = vector.extract_strided_slice %205 {offsets = [0, 256], sizes = [2, 128], strides = [1, 1]} : vector<2x512xf32> to vector<2x128xf32>
    %219 = math.tanh %218 : vector<2x128xf32>
    %220 = vector.extract_strided_slice %205 {offsets = [0, 384], sizes = [2, 128], strides = [1, 1]} : vector<2x512xf32> to vector<2x128xf32>
    %221 = arith.negf %220 : vector<2x128xf32>
    %222 = math.exp %221 : vector<2x128xf32>
    %cst_42 = arith.constant 1.000000e+00 : f32
    %223 = vector.broadcast %cst_42 : f32 to vector<2x128xf32>
    %224 = arith.addf %223, %222 : vector<2x128xf32>
    %225 = arith.divf %223, %224 : vector<2x128xf32>
    %226 = arith.mulf %217, %198 : vector<2x128xf32>
    %227 = arith.mulf %211, %219 : vector<2x128xf32>
    %228 = arith.addf %226, %227 : vector<2x128xf32>
    %229 = math.tanh %228 : vector<2x128xf32>
    %230 = arith.mulf %225, %229 : vector<2x128xf32>
    %231 = arith.truncf %230 : vector<2x128xf32> to vector<2x128xbf16>
    %cst_43 = arith.constant dense<0.000000e+00> : vector<2x512xf32>
    %232 = tpu.matmul %231, %0, %cst_43 {dimension_numbers = #tpu.dot_dimension_numbers<[1], [0], [0], [1], [0, 0, 1, 1], [], []>} : vector<2x128xbf16>, vector<128x512xbf16>, vector<2x512xf32> -> vector<2x512xf32>
    %233 = vector.extract_strided_slice %24 {offsets = [7, 0, 0], sizes = [1, 2, 512], strides = [1, 1, 1]} : vector<8x2x512xf32> to vector<1x2x512xf32>
    %234 = vector.shape_cast %233 : vector<1x2x512xf32> to vector<2x512xf32>
    %235 = arith.addf %232, %234 : vector<2x512xf32>
    %236 = vector.extract_strided_slice %235 {offsets = [0, 0], sizes = [2, 128], strides = [1, 1]} : vector<2x512xf32> to vector<2x128xf32>
    %237 = arith.negf %236 : vector<2x128xf32>
    %238 = math.exp %237 : vector<2x128xf32>
    %cst_44 = arith.constant 1.000000e+00 : f32
    %239 = vector.broadcast %cst_44 : f32 to vector<2x128xf32>
    %240 = arith.addf %239, %238 : vector<2x128xf32>
    %241 = arith.divf %239, %240 : vector<2x128xf32>
    %242 = vector.extract_strided_slice %235 {offsets = [0, 128], sizes = [2, 128], strides = [1, 1]} : vector<2x512xf32> to vector<2x128xf32>
    %243 = arith.negf %242 : vector<2x128xf32>
    %244 = math.exp %243 : vector<2x128xf32>
    %cst_45 = arith.constant 1.000000e+00 : f32
    %245 = vector.broadcast %cst_45 : f32 to vector<2x128xf32>
    %246 = arith.addf %245, %244 : vector<2x128xf32>
    %247 = arith.divf %245, %246 : vector<2x128xf32>
    %248 = vector.extract_strided_slice %235 {offsets = [0, 256], sizes = [2, 128], strides = [1, 1]} : vector<2x512xf32> to vector<2x128xf32>
    %249 = math.tanh %248 : vector<2x128xf32>
    %250 = vector.extract_strided_slice %235 {offsets = [0, 384], sizes = [2, 128], strides = [1, 1]} : vector<2x512xf32> to vector<2x128xf32>
    %251 = arith.negf %250 : vector<2x128xf32>
    %252 = math.exp %251 : vector<2x128xf32>
    %cst_46 = arith.constant 1.000000e+00 : f32
    %253 = vector.broadcast %cst_46 : f32 to vector<2x128xf32>
    %254 = arith.addf %253, %252 : vector<2x128xf32>
    %255 = arith.divf %253, %254 : vector<2x128xf32>
    %256 = arith.mulf %247, %228 : vector<2x128xf32>
    %257 = arith.mulf %241, %249 : vector<2x128xf32>
    %258 = arith.addf %256, %257 : vector<2x128xf32>
    %259 = math.tanh %258 : vector<2x128xf32>
    %260 = arith.mulf %255, %259 : vector<2x128xf32>
    %261 = arith.truncf %260 : vector<2x128xf32> to vector<2x128xbf16>
    %cst_47 = arith.constant dense<0.000000e+00> : vector<2x512xf32>
    %262 = tpu.matmul %261, %0, %cst_47 {dimension_numbers = #tpu.dot_dimension_numbers<[1], [0], [0], [1], [0, 0, 1, 1], [], []>} : vector<2x128xbf16>, vector<128x512xbf16>, vector<2x512xf32> -> vector<2x512xf32>
    %c0_48 = arith.constant 0 : index
    %c0_49 = arith.constant 0 : index
    %263 = vector.load %arg4[%c0_48, %c0_49] : memref<1x512xf32, #tpu.memory_space<vmem>>, vector<1x512xf32>
    %264 = vector.broadcast %263 : vector<1x512xf32> to vector<2x512xf32>
    %265 = arith.addf %262, %264 : vector<2x512xf32>
    %266 = vector.extract_strided_slice %265 {offsets = [0, 0], sizes = [2, 128], strides = [1, 1]} : vector<2x512xf32> to vector<2x128xf32>
    %267 = arith.negf %266 : vector<2x128xf32>
    %268 = math.exp %267 : vector<2x128xf32>
    %cst_50 = arith.constant 1.000000e+00 : f32
    %269 = vector.broadcast %cst_50 : f32 to vector<2x128xf32>
    %270 = arith.addf %269, %268 : vector<2x128xf32>
    %271 = arith.divf %269, %270 : vector<2x128xf32>
    %272 = vector.extract_strided_slice %265 {offsets = [0, 128], sizes = [2, 128], strides = [1, 1]} : vector<2x512xf32> to vector<2x128xf32>
    %273 = arith.negf %272 : vector<2x128xf32>
    %274 = math.exp %273 : vector<2x128xf32>
    %cst_51 = arith.constant 1.000000e+00 : f32
    %275 = vector.broadcast %cst_51 : f32 to vector<2x128xf32>
    %276 = arith.addf %275, %274 : vector<2x128xf32>
    %277 = arith.divf %275, %276 : vector<2x128xf32>
    %278 = vector.extract_strided_slice %265 {offsets = [0, 256], sizes = [2, 128], strides = [1, 1]} : vector<2x512xf32> to vector<2x128xf32>
    %279 = math.tanh %278 : vector<2x128xf32>
    %280 = vector.extract_strided_slice %265 {offsets = [0, 384], sizes = [2, 128], strides = [1, 1]} : vector<2x512xf32> to vector<2x128xf32>
    %281 = arith.negf %280 : vector<2x128xf32>
    %282 = math.exp %281 : vector<2x128xf32>
    %cst_52 = arith.constant 1.000000e+00 : f32
    %283 = vector.broadcast %cst_52 : f32 to vector<2x128xf32>
    %284 = arith.addf %283, %282 : vector<2x128xf32>
    %285 = arith.divf %283, %284 : vector<2x128xf32>
    %286 = arith.mulf %277, %258 : vector<2x128xf32>
    %287 = arith.mulf %271, %279 : vector<2x128xf32>
    %288 = arith.addf %286, %287 : vector<2x128xf32>
    %289 = math.tanh %288 : vector<2x128xf32>
    %290 = arith.mulf %285, %289 : vector<2x128xf32>
    %c0_53 = arith.constant 0 : index
    %c0_54 = arith.constant 0 : index
    %291 = vector.load %arg5[%c0_53, %c0_54] : memref<1x128xf32, #tpu.memory_space<vmem>>, vector<1x128xf32>
    %292 = vector.broadcast %291 : vector<1x128xf32> to vector<2x128xf32>
    %293 = arith.mulf %290, %292 : vector<2x128xf32>
    %cst_55 = arith.constant dense<0.000000e+00> : vector<2xf32>
    %294 = vector.multi_reduction <add>, %293, %cst_55 [1] : vector<2x128xf32> to vector<2xf32>
    %295 = vector.shape_cast %294 : vector<2xf32> to vector<2x1xf32>
    %c0_56 = arith.constant 0 : index
    %c0_57 = arith.constant 0 : index
    %296 = vector.load %arg6[%c0_56, %c0_57] : memref<1x1xf32, #tpu.memory_space<vmem>>, vector<1x1xf32>
    %297 = vector.broadcast %296 : vector<1x1xf32> to vector<2x1xf32>
    %298 = arith.addf %295, %297 : vector<2x1xf32>
    %299 = arith.negf %298 : vector<2x1xf32>
    %300 = math.exp %299 : vector<2x1xf32>
    %cst_58 = arith.constant 1.000000e+00 : f32
    %301 = vector.broadcast %cst_58 : f32 to vector<2x1xf32>
    %302 = arith.addf %301, %300 : vector<2x1xf32>
    %303 = arith.divf %301, %302 : vector<2x1xf32>
    %cst_59 = arith.constant 1.000000e+00 : f32
    %304 = vector.broadcast %cst_59 : f32 to vector<2x1xf32>
    %305 = arith.mulf %304, %303 : vector<2x1xf32>
    %c0_60 = arith.constant 0 : index
    %c0_61 = arith.constant 0 : index
    %306 = vector.load %arg7[%c0_60, %c0_61] : memref<2x1xf32, #tpu.memory_space<vmem>>, vector<2x1xf32>
    tpu.vector_store %arg7[%c0_60, %c0_61], %305 {strides = array<i32>} : memref<2x1xf32, #tpu.memory_space<vmem>>, vector<2x1xf32>,
    return
  }
}

</mosaic_0001>

<bundles_post_ra>
// kernel: actor_forward.1
= control target key start
LH: loop header
LB: loop body
LE: loop exit
PB: predicated region body
PF: predicated region fallthrough
CT: control target
= control target key end

     0   :  { %s2573_s0 = inlined_call_operand.vmem [shape: f32[8,2,2], index: 0, kind: input, shape index: {}]   ;;  %s2574_s1 = inlined_call_operand.vmem [shape: f32[2,512], index: 1, kind: input, shape index: {}]   ;;  %s2575_s2 = inlined_call_operand.vmem [shape: f32[1,512], index: 2, kind: input, shape index: {}]   ;;  %s2576_s3 = inlined_call_operand.hbm [shape: bf16[128,512], index: 3, kind: input, shape index: {}]   ;;  %s2577_s4 = inlined_call_operand.vmem [shape: f32[1,512], index: 4, kind: input, shape index: {}]   ;;  %s2578_s5 = inlined_call_operand.vmem [shape: f32[1,128], index: 5, kind: input, shape index: {}]   ;;  %s2579_s6 = inlined_call_operand.<no memory space> [shape: f32[1,1], index: 6, kind: input, shape index: {}]   ;;  %s2580_s7 = inlined_call_operand.vmem [shape: f32[2,1], index: 7, kind: output, shape index: {}]  }
   0x1   :  { %v12_v0 = vstv %s2579_s6 }
   0x2   :  { %13 = vst [vmem:[#allocation2] sm:$0x1] %v12_v0 }
   0x3   :  { %14 = vsyncpa [#allocation4], 0  ;;  %s1793_s26 = smov [#allocation3]   ;;  %s1769_s30 = scalar_lea.hbm %s2576_s3, 4096 }
   0x4   :  { %s26_s27 = sshll.u32 %s1793_s26, 4  ;;  %p1770_p0 = scmp.ne.s32.totalorder %s2576_s3, %s1769_s30  ;;  %s27_s27 = int_to_ptr.vmem [resolvable:$true] %s26_s27 }
   0x5   :  { %p1773_p1 = scmp.lt.u32.totalorder %s1769_s30, %s2576_s3 }
   0x7   :  { %p1775_p2 = pnand %p1773_p1, %p1770_p0 }
   0x9   :  { %1778 = shalt.err (!%p1775_p2)
}
   0xa   :  { %s1779_s6 = scalar_lea.vmem %s27_s27, 4096  ;;  %p1784_p4 = scmp.lt.s32.totalorder %s27_s27, %s27_s27 }
   0xb   :  { %p1780_p3 = scmp.ne.s32.totalorder %s27_s27, %s1779_s6  ;;  %p1785_p5 = scmp.lt.s32.totalorder %s1779_s6, %s1779_s6 }
   0xd   :  { %p1786_p6 = por %p1785_p5, %p1784_p4 }
   0xf   :  { %p1787_p7 = pnand %p1786_p6, %p1780_p3 }
  0x11   :  { %1790 = shalt.err (!%p1787_p7)
}
  0x12   :  { %s1794_s12 = smov 256   ;;  %s1795_s13 = smov 16  }
  0x13   :  { %32 = dma.hbm_to_vmem [thread:$0]  %s2576_s3, 4096, %s27_s27, [#allocation4], %s1794_s12, %s1794_s12, %s1795_s13  }
  0x14   :  { %1791 = dma.done.wait [#allocation4], 4096  }
  0x15   :  { %1792 = vsyncadd [#allocation4], 4294963200  ;;  %v2581_v1 = vmov 0   ;;  %v76_v2 = vld [vmem:[%s2573_s0 + $0x2] sm:$0x3]  ;;  %v1797_v4 = vmov 1   ;;  %v125_v43 = vlaneseq }
  0x16   :  { %1537 = vset.pattern.permute.xlu1 %v2581_v1  ;;  %1535 = vset.pattern.permute.xlu0 %v2581_v1  ;;  %v75_v3 = vld [vmem:[%s2573_s0] sm:$0x3]  ;;  %v77_v5 = vld [vmem:[%s2573_s0 + $0x4] sm:$0x3]  ;;  %v78_v6 = vld [vmem:[%s2573_s0 + $0x6] sm:$0x3] }
  0x17   :  { %590 = vmatprep.mubr.bf16.mxu0 %v2581_v1  ;;  %631 = vmatprep.mubr.bf16.mxu1 %v2581_v1  ;;  %v79_v7 = vld [vmem:[%s2573_s0 + $0x8] sm:$0x3]  ;;  %v80_v8 = vld [vmem:[%s2573_s0 + $0xa] sm:$0x3]  ;;  %v81_v9 = vld [vmem:[%s2573_s0 + $0xc] sm:$0x3] }
  0x18   :  { %91 = vperm.xlu1 %1537, %v76_v2   ;;  %86 = vperm.xlu0 %1535, %v75_v3   ;;  %v1879_v10 = vld [vmem:[#allocation3 + $0x4] ss:$16 sps:$4 sm:$0xff]   ;;  %v1881_v11 = vld [vmem:[#allocation3 + $0xc] ss:$16 sps:$4 sm:$0xff]   ;;  %v1883_v12 = vld [vmem:[#allocation3] ss:$16 sps:$4 sm:$0xff]  }
  0x19   :  { %2618 = vst [vmem:[#allocation6_spill] sm:$0xff] %v1879_v10  ;;  %2619 = vst [vmem:[#allocation7_spill] sm:$0xff] %v1881_v11  ;;  %v1885_v13 = vld [vmem:[#allocation3 + $0x8] ss:$16 sps:$4 sm:$0xff]   ;;  %v82_v14 = vld [vmem:[%s2573_s0 + $0xe] sm:$0x3]  ;;  %558 = vmatprep.subr.bf16.mxu0 %v1879_v10  ;;  %599 = vmatprep.subr.bf16.mxu1 %v1881_v11 }
  0x1a   :  { %559 = vmatpush1.bf16.msra.mxu0 %v1883_v12  ;;  %600 = vmatpush1.bf16.msra.mxu1 %v1885_v13  ;;  %v1894_v15 = vld [vmem:[#allocation3 + $0x24] ss:$16 sps:$4 sm:$0xff]   ;;  %v1896_v16 = vld [vmem:[#allocation3 + $0x2c] ss:$16 sps:$4 sm:$0xff]   ;;  %v1898_v17 = vld [vmem:[#allocation3 + $0x20] ss:$16 sps:$4 sm:$0xff]  }
  0x1b   :  { %v1900_v18 = vld [vmem:[#allocation3 + $0x28] ss:$16 sps:$4 sm:$0xff]   ;;  %560 = vmatprep.subr.bf16.mxu0 %v1894_v15  ;;  %601 = vmatprep.subr.bf16.mxu1 %v1896_v16  ;;  %v1906_v19 = vld [vmem:[#allocation3 + $0x44] ss:$16 sps:$4 sm:$0xff]   ;;  %v1908_v20 = vld [vmem:[#allocation3 + $0x4c] ss:$16 sps:$4 sm:$0xff]  }
  0x1c   :  { %1538 = vset.pattern.permute.xlu1 %v1797_v4  ;;  %1536 = vset.pattern.permute.xlu0 %v1797_v4  ;;  %v1910_v21 = vld [vmem:[#allocation3 + $0x40] ss:$16 sps:$4 sm:$0xff]   ;;  %v1912_v22 = vld [vmem:[#allocation3 + $0x48] ss:$16 sps:$4 sm:$0xff]   ;;  %v1918_v23 = vld [vmem:[#allocation3 + $0x64] ss:$16 sps:$4 sm:$0xff]  }
  0x1d   :  { %184 = vperm.xlu1 %1538, %v76_v2   ;;  %180 = vperm.xlu0 %1536, %v75_v3   ;;  %v1920_v24 = vld [vmem:[#allocation3 + $0x6c] ss:$16 sps:$4 sm:$0xff]   ;;  %v1922_v25 = vld [vmem:[#allocation3 + $0x60] ss:$16 sps:$4 sm:$0xff]   ;;  %v1924_v26 = vld [vmem:[#allocation3 + $0x68] ss:$16 sps:$4 sm:$0xff]  }
  0x1e   :  { %561 = vmatpush1.bf16.msra.mxu0 %v1898_v17  ;;  %602 = vmatpush1.bf16.msra.mxu1 %v1900_v18  ;;  %v1928_v27 = vld [vmem:[#allocation3 + $0x84] ss:$16 sps:$4 sm:$0xff]   ;;  %v1930_v28 = vld [vmem:[#allocation3 + $0x8c] ss:$16 sps:$4 sm:$0xff]   ;;  %v1933_v29 = vld [vmem:[#allocation3 + $0x80] ss:$16 sps:$4 sm:$0xff]  }
  0x1f   :  { %562 = vmatprep.subr.bf16.mxu0 %v1906_v19  ;;  %603 = vmatprep.subr.bf16.mxu1 %v1908_v20  ;;  %v1937_v30 = vld [vmem:[#allocation3 + $0x88] ss:$16 sps:$4 sm:$0xff]   ;;  %v1939_v31 = vld [vmem:[#allocation3 + $0xa4] ss:$16 sps:$4 sm:$0xff]   ;;  %v1942_v32 = vld [vmem:[#allocation3 + $0xac] ss:$16 sps:$4 sm:$0xff]  }
  0x20   :  { %v1945_v33 = vld [vmem:[#allocation3 + $0xa0] ss:$16 sps:$4 sm:$0xff]   ;;  %v1949_v34 = vld [vmem:[#allocation3 + $0xa8] ss:$16 sps:$4 sm:$0xff]   ;;  %v1951_v35 = vld [vmem:[#allocation3 + $0xc4] ss:$16 sps:$4 sm:$0xff]  }
  0x21   :  { %1539 = vset.pattern.permute.xlu1 %v2581_v1  ;;  %188 = vperm.xlu0 %1536, %v77_v5   ;;  %v1954_v36 = vld [vmem:[#allocation3 + $0xcc] ss:$16 sps:$4 sm:$0xff]   ;;  %v1957_v37 = vld [vmem:[#allocation3 + $0xc0] ss:$16 sps:$4 sm:$0xff]   ;;  %v1961_v38 = vld [vmem:[#allocation3 + $0xc8] ss:$16 sps:$4 sm:$0xff]  }
  0x22   :  { %96 = vperm.xlu1 %1539, %v77_v5   ;;  %563 = vmatpush1.bf16.msra.mxu0 %v1910_v21  ;;  %2620 = vst [vmem:[#allocation8_spill] sm:$0xff] %v1954_v36  ;;  %2621 = vst [vmem:[#allocation9_spill] sm:$0xff] %v1957_v37  ;;  %v1963_v39 = vld [vmem:[#allocation3 + $0xe4] ss:$16 sps:$4 sm:$0xff]   ;;  %v1966_v40 = vld [vmem:[#allocation3 + $0xec] ss:$16 sps:$4 sm:$0xff]  }
  0x23   :  { %604 = vmatpush1.bf16.msra.mxu1 %v1912_v22  ;;  %564 = vmatprep.subr.bf16.mxu0 %v1918_v23  ;;  %2622 = vst [vmem:[#allocation10_spill] sm:$0xff] %v1961_v38  ;;  %2623 = vst [vmem:[#allocation11_spill] sm:$0xff] %v1963_v39  ;;  %v1969_v41 = vld [vmem:[#allocation3 + $0xe0] ss:$16 sps:$4 sm:$0xff]   ;;  %v1973_v42 = vld [vmem:[#allocation3 + $0xe8] ss:$16 sps:$4 sm:$0xff]  }
  0x24   :  { %605 = vmatprep.subr.bf16.mxu1 %v1920_v24  ;;  %2624 = vst [vmem:[#allocation12_spill] sm:$0xff] %v1966_v40  ;;  %2625 = vst [vmem:[#allocation13_spill] sm:$0xff] %v1969_v41  ;;  %v126_v44 = vshrl.u32 %v125_v43, 7  ;;  %v83_v46 = vld [vmem:[%s2574_s1] ss:$2 sm:$0xf] }
  0x25   :  { %192 = vperm.xlu0 %1536, %v78_v6   ;;  %2626 = vst [vmem:[#allocation14_spill] sm:$0xff] %v1973_v42  ;;  %v1467_v48 = vld [vmem:[%s2574_s1 + $0x1] ss:$2 sm:$0xf]  ;;  %vm1442_vm0 = vcmask 1041408   ;;  %vm1460_vm1 = vcmask 1024  }
  0x26   :  { %101 = vperm.xlu1 %1539, %v78_v6   ;;  %565 = vmatpush1.bf16.msra.mxu0 %v1922_v25  ;;  %v1980_v45 = vsub.s32 0, %v126_v44  ;;  %v1985_v47 = vsub.s32 1, %v126_v44  ;;  %v1990_v49 = vsub.s32 3, %v126_v44  ;;  %v1997_v53 = vsub.s32 2, %v126_v44  ;;  %v2002_v54 = vld [vmem:[%s2575_s2] sm:$0xf] }
  0x27   :  { %606 = vmatpush1.bf16.msra.mxu1 %v1924_v26  ;;  %566 = vmatprep.subr.bf16.mxu0 %v1928_v27  ;;  %v322_v62 = vld [vmem:[%s2577_s4] sm:$0xf] }
  0x28   :  { %607 = vmatprep.subr.bf16.mxu1 %v1930_v28  ;;  %2627 = vst [vmem:[#allocation15_spill] sm:$0xff] %v1980_v45  ;;  %2628 = vst [vmem:[#allocation16_spill] sm:$0xff] %v1985_v47  ;;  %v1995_v52 = vrot.slane %v83_v46, %v1980_v45  ;;  %v2005_v55 = vrot.slane %v83_v46, %v1985_v47  ;;  %v2008_v56 = vrot.slane %v1467_v48, %v1980_v45 }
  0x29   :  { %196 = vperm.xlu0 %1536, %v79_v7   ;;  %2629 = vst [vmem:[#allocation17_spill] sm:$0xff] %v1990_v49  ;;  %2631 = vst [vmem:[#allocation19_spill] sm:$0xff] %v1997_v53  ;;  %v2011_v57 = vrot.slane %v1467_v48, %v1985_v47  ;;  %v2014_v58 = vrot.slane %v1467_v48, %v1990_v49  ;;  %v2017_v59 = vrot.slane %v1467_v48, %v1997_v53 }
  0x2a   :  { %106 = vperm.xlu1 %1539, %v79_v7   ;;  %567 = vmatpush1.bf16.msra.mxu0 %v1933_v29  ;;  %v2020_v60 = vrot.slane %v83_v46, %v1990_v49  ;;  %v301_v61 = vrot.slane %v2002_v54, %v1980_v45  ;;  %v2028_v63 = vrot.slane %v83_v46, %v1997_v53 }
  0x2b   :  { %608 = vmatpush1.bf16.msra.mxu1 %v1937_v30  ;;  %568 = vmatprep.subr.bf16.mxu0 %v1939_v31  ;;  %2632 = vst [vmem:[#allocation20_spill] sm:$0xff] %v2011_v57  ;;  %2633 = vst [vmem:[#allocation21_spill] sm:$0xff] %v2014_v58  ;;  %v305_v3 = vrot.slane %v2002_v54, %v1985_v47 }
  0x2c   :  { %609 = vmatprep.subr.bf16.mxu1 %v1942_v32  ;;  %2634 = vst [vmem:[#allocation22_spill] sm:$0xff] %v2017_v59  ;;  %2635 = vst [vmem:[#allocation23_spill] sm:$0xff] %v2028_v63 }
  0x2d   :  { %200 = vperm.xlu0 %1536, %v80_v8  }
  0x2e   :  { %111 = vperm.xlu1 %1539, %v80_v8   ;;  %569 = vmatpush1.bf16.msra.mxu0 %v1945_v33 }
  0x2f   :  { %610 = vmatpush1.bf16.msra.mxu1 %v1949_v34  ;;  %570 = vmatprep.subr.bf16.mxu0 %v1951_v35 }
  0x30   :  { %611 = vmatprep.subr.bf16.mxu1 %v1954_v36 }
  0x31   :  { %204 = vperm.xlu0 %1536, %v81_v9  }
  0x32   :  { %116 = vperm.xlu1 %1539, %v81_v9   ;;  %571 = vmatpush1.bf16.msra.mxu0 %v1957_v37 }
  0x33   :  { %612 = vmatpush1.bf16.msra.mxu1 %v1961_v38  ;;  %572 = vmatprep.subr.bf16.mxu0 %v1963_v39 }
  0x34   :  { %613 = vmatprep.subr.bf16.mxu1 %v1966_v40 }
  0x35   :  { %208 = vperm.xlu0 %1536, %v82_v14  }
  0x36   :  { %121 = vperm.xlu1 %1539, %v82_v14   ;;  %573 = vmatpush1.bf16.msra.mxu0 %v1969_v41  ;;  %v2042_v14 = vadd.f32 %v322_v62, %v2002_v54  ;;  %v313_v62 = vrot.slane %v2002_v54, %v1990_v49 }
  0x37   :  { %614 = vmatpush1.bf16.msra.mxu1 %v1973_v42  ;;  %665 = vmatprep.subr.bf16.mxu0 %v1879_v10 }
  0x38   :  { %706 = vmatprep.subr.bf16.mxu1 %v1881_v11  ;;  %2637 = vst [vmem:[#allocation25_spill] sm:$0xff] %v2042_v14 }
  0x97   :  { %v87_v50 = vpop.permute.xlu0 %86  ;;  %v1992_v51 = vpop.permute.xlu1 %91 }
  0x98   :  { %2630 = vst [vmem:[#allocation18_spill] sm:$0xff] %v1992_v51  ;;  %v145_v0 = vmul.f32 %v1995_v52, %v87_v50  ;;  %v149_v2 = vmul.f32 %v1995_v52, %v1992_v51  ;;  %v146_v6 = vmul.f32 %v2005_v55, %v87_v50  ;;  %v148_v46 = vmul.f32 %v2020_v60, %v87_v50 }
  0x99   :  { %v147_v47 = vmul.f32 %v2028_v63, %v87_v50  ;;  %v309_v51 = vrot.slane %v2002_v54, %v1997_v53  ;;  %v2057_v50 = vrot.slane %v2042_v14, %v1980_v45 }
  0x9c   :  { %v181_v4 = vpop.permute.xlu0 %180  ;;  %v2035_v5 = vpop.permute.xlu1 %184 }
  0x9d   :  { %2636 = vst [vmem:[#allocation24_spill] sm:$0xff] %v2035_v5  ;;  %v232_v7 = vmul.f32 %v2008_v56, %v181_v4  ;;  %v233_v8 = vmul.f32 %v2011_v57, %v181_v4  ;;  %v235_v9 = vmul.f32 %v2014_v58, %v181_v4  ;;  %v234_v43 = vmul.f32 %v2017_v59, %v181_v4 }
  0x9e   :  { %v236_v44 = vmul.f32 %v2008_v56, %v2035_v5 }
  0x9f   :  { %v264_v48 = vadd.f32 %v232_v7, %v145_v0  ;;  %v265_v1 = vadd.f32 %v233_v8, %v146_v6  ;;  %v267_v42 = vadd.f32 %v235_v9, %v148_v46  ;;  %v266_v39 = vadd.f32 %v234_v43, %v147_v47 }
  0xa0   :  { %v189_v11 = vpop.permute.xlu0 %188  ;;  %v268_v10 = vadd.f32 %v236_v44, %v149_v2 }
  0xa1   :  { %v318_v41 = vadd.f32 %v301_v61, %v264_v48  ;;  %v319_v4 = vadd.f32 %v305_v3, %v265_v1  ;;  %v97_v40 = vpop.permute.xlu1 %96  ;;  %v240_v5 = vmul.f32 %v2008_v56, %v189_v11  ;;  %v241_v0 = vmul.f32 %v2011_v57, %v189_v11 }
  0xa2   :  { %v242_v2 = vmul.f32 %v2017_v59, %v189_v11  ;;  %v243_v8 = vmul.f32 %v2014_v58, %v189_v11  ;;  %v153_v54 = vmul.f32 %v1995_v52, %v97_v40  ;;  %v154_v1 = vmul.f32 %v2005_v55, %v97_v40 }
  0xa3   :  { %v1468_v6 = vmul.f32 -1.442695, %v318_v41  ;;  %v1469_v7 = vmul.f32 -1.442695, %v319_v4  ;;  %v155_v47 = vmul.f32 %v2028_v63, %v97_v40  ;;  %v156_v61 = vmul.f32 %v2020_v60, %v97_v40 }
  0xa4   :  { %v193_v3 = vpop.permute.xlu0 %192  ;;  %v321_v9 = vadd.f32 %v313_v62, %v267_v42  ;;  %v2074_v42 = vadd.f32 %v2057_v50, %v268_v10 }
  0xa5   :  { %1588 = vpow2.f32 %v1468_v6  ;;  %v244_v43 = vmul.f32 %v2008_v56, %v193_v3  ;;  %v245_v41 = vmul.f32 %v2011_v57, %v193_v3  ;;  %v102_v44 = vpop.permute.xlu1 %101  ;;  %v246_v46 = vmul.f32 %v2017_v59, %v193_v3 }
  0xa6   :  { %1590 = vpow2.f32 %v1469_v7  ;;  %v247_v11 = vmul.f32 %v2014_v58, %v193_v3  ;;  %v157_v48 = vmul.f32 %v1995_v52, %v102_v44  ;;  %v158_v4 = vmul.f32 %v2005_v55, %v102_v44  ;;  %2638 = vst [vmem:[#allocation26_spill] sm:$0xff] %v2074_v42 }
  0xa7   :  { %v159_v45 = vmul.f32 %v2028_v63, %v102_v44  ;;  %v160_v40 = vmul.f32 %v2020_v60, %v102_v44  ;;  %v272_v6 = vadd.f32 %v240_v5, %v153_v54  ;;  %v2076_v49 = vadd.f32 %v242_v2, %v155_v47 }
  0xa8   :  { %v197_v62 = vpop.permute.xlu0 %196  ;;  %v2078_v7 = vadd.f32 %v241_v0, %v154_v1  ;;  %v2080_v14 = vadd.f32 %v243_v8, %v156_v61  ;;  %v320_v3 = vadd.f32 %v309_v51, %v266_v39  ;;  %v1470_v38 = vmul.f32 -1.442695, %v321_v9 }
  0xa9   :  { %2639 = vst [vmem:[#allocation27_spill] sm:$0xff] %v2076_v49  ;;  %v107_v53 = vpop.permute.xlu1 %106  ;;  %v248_v37 = vmul.f32 %v2008_v56, %v197_v62  ;;  %v249_v36 = vmul.f32 %v2011_v57, %v197_v62  ;;  %v250_v44 = vmul.f32 %v2017_v59, %v197_v62  ;;  %v2089_v0 = vadd.f32 %v2057_v50, %v272_v6 }
  0xaa   :  { %2640 = vst [vmem:[#allocation28_spill] sm:$0xff] %v2078_v7  ;;  %2641 = vst [vmem:[#allocation29_spill] sm:$0xff] %v2080_v14  ;;  %v161_v10 = vmul.f32 %v1995_v52, %v107_v53  ;;  %v162_v42 = vmul.f32 %v2005_v55, %v107_v53  ;;  %v163_v5 = vmul.f32 %v2028_v63, %v107_v53  ;;  %1592 = vtanh.f32 %v320_v3 }
  0xab   :  { %2642 = vst [vmem:[#allocation30_spill] sm:$0xff] %v2089_v0  ;;  %v276_v8 = vadd.f32 %v244_v43, %v157_v48  ;;  %v2091_v39 = vadd.f32 %v246_v46, %v159_v45  ;;  %v2093_v51 = vadd.f32 %v245_v41, %v158_v4  ;;  %v2095_v54 = vadd.f32 %v247_v11, %v160_v40 }
  0xac   :  { %v201_v2 = vpop.permute.xlu0 %200  ;;  %1594 = vpow2.f32 %v1470_v38  ;;  %v251_v47 = vmul.f32 %v2014_v58, %v197_v62  ;;  %v164_v61 = vmul.f32 %v2020_v60, %v107_v53  ;;  %v280_v38 = vadd.f32 %v248_v37, %v161_v10 }
  0xad   :  { %2643 = vst [vmem:[#allocation31_spill] sm:$0xff] %v2091_v39  ;;  %2644 = vst [vmem:[#allocation32_spill] sm:$0xff] %v2093_v51  ;;  %v112_v1 = vpop.permute.xlu1 %111  ;;  %v252_v9 = vmul.f32 %v2008_v56, %v201_v2  ;;  %v253_v6 = vmul.f32 %v2011_v57, %v201_v2  ;;  %v254_v43 = vmul.f32 %v2017_v59, %v201_v2 }
  0xae   :  { %2645 = vst [vmem:[#allocation33_spill] sm:$0xff] %v2095_v54  ;;  %v255_v45 = vmul.f32 %v2014_v58, %v201_v2  ;;  %v2104_v41 = vadd.f32 %v2057_v50, %v276_v8  ;;  %v2106_v4 = vadd.f32 %v250_v44, %v163_v5  ;;  %v2108_v40 = vadd.f32 %v249_v36, %v162_v42 }
  0xaf   :  { %v1589_v14 = vpop.eup %1588  ;;  %v165_v62 = vmul.f32 %v1995_v52, %v112_v1  ;;  %v166_v3 = vmul.f32 %v2005_v55, %v112_v1  ;;  %v167_v54 = vmul.f32 %v2028_v63, %v112_v1  ;;  %v168_v2 = vmul.f32 %v2020_v60, %v112_v1 }
  0xb0   :  { %2646 = vst [vmem:[#allocation34_spill] sm:$0xff] %v2104_v41  ;;  %v1591_v46 = vpop.eup %1590  ;;  %v376_v11 = vadd.f32 1.0, %v1589_v14  ;;  %v205_v48 = vpop.permute.xlu0 %204  ;;  %2647 = vst [vmem:[#allocation35_spill] sm:$0xff] %v2106_v4  ;;  %v2123_v1 = vadd.f32 %v2057_v50, %v280_v38  ;;  %v2133_v38 = vadd.f32 %v251_v47, %v164_v61 }
  0xb1   :  { %2648 = vst [vmem:[#allocation36_spill] sm:$0xff] %v2108_v40  ;;  %v382_v53 = vadd.f32 1.0, %v1591_v46  ;;  %v117_v51 = vpop.permute.xlu1 %116  ;;  %v256_v8 = vmul.f32 %v2008_v56, %v205_v48  ;;  %v257_v14 = vmul.f32 %v2011_v57, %v205_v48  ;;  %v258_v37 = vmul.f32 %v2017_v59, %v205_v48 }
  0xb2   :  { %1596 = vrcp.f32 %v376_v11  ;;  %v259_v36 = vmul.f32 %v2014_v58, %v205_v48  ;;  %v169_v42 = vmul.f32 %v1995_v52, %v117_v51  ;;  %v170_v44 = vmul.f32 %v2005_v55, %v117_v51  ;;  %2649 = vst [vmem:[#allocation37_spill] sm:$0xff] %v2123_v1 }
  0xb3   :  { %1598 = vrcp.f32 %v382_v53  ;;  %v171_v10 = vmul.f32 %v2028_v63, %v117_v51  ;;  %v172_v5 = vmul.f32 %v2020_v60, %v117_v51  ;;  %v284_v1 = vadd.f32 %v252_v9, %v165_v62 }
  0xb4   :  { %v209_v46 = vpop.permute.xlu0 %208  ;;  %v1593_v7 = vpop.eup %1592  ;;  %v2137_v49 = vadd.f32 %v253_v6, %v166_v3 }
  0xb5   :  { %v260_v11 = vmul.f32 %v2008_v56, %v209_v46  ;;  %v261_v53 = vmul.f32 %v2011_v57, %v209_v46  ;;  %v262_v40 = vmul.f32 %v2017_v59, %v209_v46  ;;  %v263_v48 = vmul.f32 %v2014_v58, %v209_v46  ;;  %v122_v4 = vpop.permute.xlu1 %121 }
  0xb6   :  { %v173_v41 = vmul.f32 %v1995_v52, %v122_v4  ;;  %v174_v39 = vmul.f32 %v2005_v55, %v122_v4  ;;  %v175_v0 = vmul.f32 %v2028_v63, %v122_v4  ;;  %v176_v51 = vmul.f32 %v2020_v60, %v122_v4  ;;  %v1595_v59 = vpop.eup %1594 }
  0xb7   :  { %v2135_v56 = vadd.f32 %v254_v43, %v167_v54  ;;  %v2139_v57 = vadd.f32 %v255_v45, %v168_v2  ;;  %v288_v46 = vadd.f32 %v256_v8, %v169_v42  ;;  %v2141_v58 = vadd.f32 %v258_v37, %v171_v10  ;;  %v2662_v37 = vld [vmem:[#allocation10_spill] sm:$0xff]  ;;  %v2664_v42 = vld [vmem:[#allocation12_spill] sm:$0xff] }
  0xb8   :  { %v2143_v52 = vadd.f32 %v257_v14, %v170_v44  ;;  %v2146_v63 = vadd.f32 %v2057_v50, %v284_v1  ;;  %v2151_v47 = vadd.f32 %v259_v36, %v172_v5  ;;  %v292_v54 = vadd.f32 %v260_v11, %v173_v41  ;;  %v2663_v36 = vld [vmem:[#allocation11_spill] sm:$0xff]  ;;  %v2665_v44 = vld [vmem:[#allocation13_spill] sm:$0xff]  ;;  %v2666_v10 = vld [vmem:[#allocation14_spill] sm:$0xff] }
  0xb9   :  { %2650 = vst [vmem:[#allocation38_spill] sm:$0xff] %v2141_v58  ;;  %v2149_v4 = vadd.f32 %v2057_v50, %v288_v46  ;;  %v2153_v61 = vadd.f32 %v262_v40, %v175_v0  ;;  %v2155_v9 = vadd.f32 %v261_v53, %v174_v39  ;;  %v2157_v43 = vadd.f32 %v263_v48, %v176_v51  ;;  %v2667_v5 = vld [vmem:[#allocation6_spill] sm:$0xff]  ;;  %v2668_v1 = vld [vmem:[#allocation7_spill] sm:$0xff] }
  0xba   :  { %2651 = vst [vmem:[#allocation39_spill] sm:$0xff] %v2143_v52  ;;  %2652 = vst [vmem:[#allocation40_spill] sm:$0xff] %v2146_v63  ;;  %v389_v62 = vadd.f32 1.0, %v1595_v59  ;;  %v2160_v2 = vadd.f32 %v2057_v50, %v292_v54  ;;  %v2659_v59 = vmov 0   ;;  %v2660_v50 = vld [vmem:[#allocation8_spill] sm:$0xff]  ;;  %v2669_v11 = vld [vmem:[#allocation18_spill] sm:$0xff] }
  0xbb   :  { %2653 = vst [vmem:[#allocation41_spill] sm:$0xff] %v2149_v4  ;;  %2654 = vst [vmem:[#allocation42_spill] sm:$0xff] %v2151_v47  ;;  %v150_v53 = vmul.f32 %v2005_v55, %v2669_v11  ;;  %v2670_v48 = vld [vmem:[#allocation23_spill] sm:$0xff]  ;;  %v152_v46 = vmul.f32 %v2020_v60, %v2669_v11  ;;  %v2671_v54 = vld [vmem:[#allocation24_spill] sm:$0xff] }
  0xbc   :  { %2655 = vst [vmem:[#allocation43_spill] sm:$0xff] %v2153_v61  ;;  %2656 = vst [vmem:[#allocation44_spill] sm:$0xff] %v2155_v9  ;;  %v1597_v6 = vpop.eup %1596  ;;  %1600 = vrcp.f32 %v389_v62  ;;  %v151_v51 = vmul.f32 %v2670_v48, %v2669_v11  ;;  %v2673_v62 = vld [vmem:[#allocation22_spill] sm:$0xff]  ;;  %v2676_v55 = vld [vmem:[#allocation25_spill] sm:$0xff] }
  0xbd   :  { %2657 = vst [vmem:[#allocation45_spill] sm:$0xff] %v2157_v43  ;;  %v1599_v45 = vpop.eup %1598  ;;  %v393_v3 = vmul.f32 %v1597_v6, %v1593_v7  ;;  %2658 = vst [vmem:[#allocation46_spill] sm:$0xff] %v2160_v2  ;;  %v2661_v7 = vld [vmem:[#allocation9_spill] sm:$0xff]  ;;  %v2672_v6 = vld [vmem:[#allocation20_spill] sm:$0xff] }
  0xbe   :  { %v392_v8 = vmul.f32 0.0, %v1599_v45  ;;  %v237_v45 = vmul.f32 %v2672_v6, %v2671_v54  ;;  %v2675_v2 = vld [vmem:[#allocation19_spill] sm:$0xff]  ;;  %v2677_v48 = vld [vmem:[#allocation16_spill] sm:$0xff]  ;;  %v2678_v60 = vld [vmem:[#allocation17_spill] sm:$0xff] }
  0xbf   :  { %v2213_v43 = vrot.slane %v2676_v55, %v2675_v2  ;;  %v2217_v9 = vrot.slane %v2676_v55, %v2677_v48  ;;  %v2221_v11 = vrot.slane %v2676_v55, %v2678_v60 }
  0xc0   :  { %v2162_v14 = vadd.f32 %v393_v3, %v392_v8  ;;  %v238_v3 = vmul.f32 %v2673_v62, %v2671_v54  ;;  %v2674_v8 = vld [vmem:[#allocation21_spill] sm:$0xff] }
  0xc2   :  { %1602 = vtanh.f32 %v2162_v14 }
  0xc6   :  { %v1601_v41 = vpop.eup %1600 }
  0xcc   :  { %v1603_v0 = vpop.eup %1602 }
  0xcd   :  { %v396_v40 = vmul.f32 %v1603_v0, %v1601_v41  ;;  %v239_v41 = vmul.f32 %v2674_v8, %v2671_v54  ;;  %v270_v0 = vadd.f32 %v238_v3, %v151_v51 }
  0xcf   :  { %v397_v39 = vpack.c.bf16 %v396_v40, %v396_v40  ;;  %v269_v40 = vadd.f32 %v237_v45, %v150_v53  ;;  %v347_v6 = vadd.f32 %v2213_v43, %v270_v0 }
  0xd1   :  { %591 = vmatmul.mubr.bf16.vlgmr.msra.gmra.mrb[0].mxu0 %v397_v39  ;;  %632 = vmatmul.mubr.bf16.vlgmr.msra.gmra.mrb[0].mxu1 %v397_v39  ;;  %v271_v39 = vadd.f32 %v239_v41, %v152_v46  ;;  %v346_v51 = vadd.f32 %v2217_v9, %v269_v40  ;;  %v2679_v46 = vld [vmem:[#allocation26_spill] sm:$0xff] }
  0xd2   :  { %666 = vmatpush1.bf16.msra.mxu0 %v1883_v12  ;;  %707 = vmatpush1.bf16.msra.mxu1 %v1885_v13 }
  0xd3   :  { %667 = vmatprep.subr.bf16.mxu0 %v1894_v15  ;;  %708 = vmatprep.subr.bf16.mxu1 %v1896_v16  ;;  %v348_v53 = vadd.f32 %v2221_v11, %v271_v39 }
  0xd4   :  { %697 = vmatprep.mubr.bf16.mxu0 %v2659_v59  ;;  %738 = vmatprep.mubr.bf16.mxu1 %v2659_v59 }
  0xd6   :  { %668 = vmatpush1.bf16.msra.mxu0 %v1898_v17  ;;  %709 = vmatpush1.bf16.msra.mxu1 %v1900_v18 }
  0xd7   :  { %669 = vmatprep.subr.bf16.mxu0 %v1906_v19  ;;  %710 = vmatprep.subr.bf16.mxu1 %v1908_v20 }
  0xda   :  { %670 = vmatpush1.bf16.msra.mxu0 %v1910_v21  ;;  %711 = vmatpush1.bf16.msra.mxu1 %v1912_v22 }
  0xdb   :  { %671 = vmatprep.subr.bf16.mxu0 %v1918_v23  ;;  %712 = vmatprep.subr.bf16.mxu1 %v1920_v24 }
  0xde   :  { %672 = vmatpush1.bf16.msra.mxu0 %v1922_v25  ;;  %713 = vmatpush1.bf16.msra.mxu1 %v1924_v26 }
  0xdf   :  { %673 = vmatprep.subr.bf16.mxu0 %v1928_v27  ;;  %714 = vmatprep.subr.bf16.mxu1 %v1930_v28 }
  0xe2   :  { %674 = vmatpush1.bf16.msra.mxu0 %v1933_v29  ;;  %715 = vmatpush1.bf16.msra.mxu1 %v1937_v30 }
  0xe3   :  { %675 = vmatprep.subr.bf16.mxu0 %v1939_v31  ;;  %716 = vmatprep.subr.bf16.mxu1 %v1942_v32 }
  0xe6   :  { %676 = vmatpush1.bf16.msra.mxu0 %v1945_v33  ;;  %717 = vmatpush1.bf16.msra.mxu1 %v1949_v34 }
  0xe7   :  { %677 = vmatprep.subr.bf16.mxu0 %v1951_v35  ;;  %718 = vmatprep.subr.bf16.mxu1 %v2660_v50 }
  0xea   :  { %678 = vmatpush1.bf16.msra.mxu0 %v2661_v7  ;;  %719 = vmatpush1.bf16.msra.mxu1 %v2662_v37 }
  0xeb   :  { %679 = vmatprep.subr.bf16.mxu0 %v2663_v36  ;;  %720 = vmatprep.subr.bf16.mxu1 %v2664_v42 }
  0xee   :  { %680 = vmatpush1.bf16.msra.mxu0 %v2665_v44  ;;  %721 = vmatpush1.bf16.msra.mxu1 %v2666_v10 }
  0xef   :  { %772 = vmatprep.subr.bf16.mxu0 %v2667_v5  ;;  %813 = vmatprep.subr.bf16.mxu1 %v2668_v1 }
 0x1a4   :  { %v592_v62 = vpop.f32.mrb[0].mxu0  ;;  %v633_v61 = vpop.f32.mrb[0].mxu1 }
 0x1a5   :  { %v593_v54 = vadd.f32 %v592_v62, %v2679_v46  ;;  %v634_v45 = vadd.f32 %v633_v61, %v347_v6  ;;  %v594_v3 = vpop.f32.mrb[1].mxu0  ;;  %v635_v8 = vpop.f32.mrb[1].mxu1 }
 0x1a6   :  { %v595_v41 = vadd.f32 %v594_v3, %v346_v51  ;;  %v636_v2 = vadd.f32 %v635_v8, %v348_v53  ;;  %v596_v48 = vpop.f32.mrb[2].mxu0  ;;  %v637_v4 = vpop.f32.mrb[2].mxu1  ;;  %v2682_v8 = vld [vmem:[#allocation29_spill] sm:$0xff] }
 0x1a7   :  { %v1503_v47 = vmul.f32 -1.442695, %v593_v54  ;;  %v597_v55 = vpop.f32.mrb[3].mxu0  ;;  %v638_v60 = vpop.f32.mrb[3].mxu1 }
 0x1a8   :  { %v1504_v52 = vmul.f32 -1.442695, %v595_v41  ;;  %v1505_v0 = vmul.f32 -1.442695, %v636_v2  ;;  %v352_v41 = vadd.f32 %v2221_v11, %v2682_v8  ;;  %v2683_v55 = vld [vmem:[#allocation30_spill] sm:$0xff] }
 0x1a9   :  { %1604 = vpow2.f32 %v1503_v47 }
 0x1aa   :  { %1606 = vpow2.f32 %v1504_v52 }
 0x1ab   :  { %1608 = vpow2.f32 %v1505_v0 }
 0x1ac   :  { %1610 = vtanh.f32 %v634_v45  ;;  %v2681_v45 = vld [vmem:[#allocation28_spill] sm:$0xff] }
 0x1ad   :  { %v350_v3 = vadd.f32 %v2217_v9, %v2681_v45 }
 0x1b3   :  { %v1605_v58 = vpop.eup %1604 }
 0x1b4   :  { %v1607_v40 = vpop.eup %1606  ;;  %v643_v63 = vadd.f32 1.0, %v1605_v58 }
 0x1b5   :  { %v649_v39 = vadd.f32 1.0, %v1607_v40  ;;  %v1609_v61 = vpop.eup %1608 }
 0x1b6   :  { %1612 = vrcp.f32 %v643_v63  ;;  %v1611_v6 = vpop.eup %1610  ;;  %v656_v51 = vadd.f32 1.0, %v1609_v61  ;;  %v2680_v63 = vld [vmem:[#allocation27_spill] sm:$0xff] }
 0x1b7   :  { %1614 = vrcp.f32 %v649_v39 }
 0x1b8   :  { %1616 = vrcp.f32 %v656_v51 }
 0x1c0   :  { %v1613_v62 = vpop.eup %1612 }
 0x1c1   :  { %v1615_v48 = vpop.eup %1614  ;;  %v660_v4 = vmul.f32 %v1613_v62, %v1611_v6 }
 0x1c2   :  { %v659_v60 = vmul.f32 %v1615_v48, %v2162_v14  ;;  %v1617_v52 = vpop.eup %1616  ;;  %v351_v14 = vadd.f32 %v2213_v43, %v2680_v63 }
 0x1c4   :  { %v2228_v53 = vadd.f32 %v660_v4, %v659_v60 }
 0x1c6   :  { %1618 = vtanh.f32 %v2228_v53 }
 0x1d0   :  { %v1619_v58 = vpop.eup %1618 }
 0x1d1   :  { %v663_v47 = vmul.f32 %v1619_v58, %v1617_v52 }
 0x1d3   :  { %v664_v2 = vpack.c.bf16 %v663_v47, %v663_v47 }
 0x1d5   :  { %698 = vmatmul.mubr.bf16.vlgmr.msra.gmra.mrb[4].mxu0 %v664_v2  ;;  %739 = vmatmul.mubr.bf16.vlgmr.msra.gmra.mrb[4].mxu1 %v664_v2 }
 0x1d6   :  { %773 = vmatpush1.bf16.msra.mxu0 %v1883_v12  ;;  %814 = vmatpush1.bf16.msra.mxu1 %v1885_v13 }
 0x1d7   :  { %774 = vmatprep.subr.bf16.mxu0 %v1894_v15  ;;  %815 = vmatprep.subr.bf16.mxu1 %v1896_v16 }
 0x1d8   :  { %804 = vmatprep.mubr.bf16.mxu0 %v2659_v59  ;;  %845 = vmatprep.mubr.bf16.mxu1 %v2659_v59 }
 0x1da   :  { %775 = vmatpush1.bf16.msra.mxu0 %v1898_v17  ;;  %816 = vmatpush1.bf16.msra.mxu1 %v1900_v18 }
 0x1db   :  { %776 = vmatprep.subr.bf16.mxu0 %v1906_v19  ;;  %817 = vmatprep.subr.bf16.mxu1 %v1908_v20 }
 0x1de   :  { %777 = vmatpush1.bf16.msra.mxu0 %v1910_v21  ;;  %818 = vmatpush1.bf16.msra.mxu1 %v1912_v22 }
 0x1df   :  { %778 = vmatprep.subr.bf16.mxu0 %v1918_v23  ;;  %819 = vmatprep.subr.bf16.mxu1 %v1920_v24 }
 0x1e2   :  { %779 = vmatpush1.bf16.msra.mxu0 %v1922_v25  ;;  %820 = vmatpush1.bf16.msra.mxu1 %v1924_v26 }
 0x1e3   :  { %780 = vmatprep.subr.bf16.mxu0 %v1928_v27  ;;  %821 = vmatprep.subr.bf16.mxu1 %v1930_v28 }
 0x1e6   :  { %781 = vmatpush1.bf16.msra.mxu0 %v1933_v29  ;;  %822 = vmatpush1.bf16.msra.mxu1 %v1937_v30 }
 0x1e7   :  { %782 = vmatprep.subr.bf16.mxu0 %v1939_v31  ;;  %823 = vmatprep.subr.bf16.mxu1 %v1942_v32 }
 0x1ea   :  { %783 = vmatpush1.bf16.msra.mxu0 %v1945_v33  ;;  %824 = vmatpush1.bf16.msra.mxu1 %v1949_v34 }
 0x1eb   :  { %784 = vmatprep.subr.bf16.mxu0 %v1951_v35  ;;  %825 = vmatprep.subr.bf16.mxu1 %v2660_v50 }
 0x1ee   :  { %785 = vmatpush1.bf16.msra.mxu0 %v2661_v7  ;;  %826 = vmatpush1.bf16.msra.mxu1 %v2662_v37 }
 0x1ef   :  { %786 = vmatprep.subr.bf16.mxu0 %v2663_v36  ;;  %827 = vmatprep.subr.bf16.mxu1 %v2664_v42 }
 0x1f2   :  { %787 = vmatpush1.bf16.msra.mxu0 %v2665_v44  ;;  %828 = vmatpush1.bf16.msra.mxu1 %v2666_v10 }
 0x1f3   :  { %879 = vmatprep.subr.bf16.mxu0 %v2667_v5  ;;  %920 = vmatprep.subr.bf16.mxu1 %v2668_v1 }
 0x2a8   :  { %v699_v46 = vpop.f32.mrb[4].mxu0  ;;  %v740_v54 = vpop.f32.mrb[4].mxu1 }
 0x2a9   :  { %v700_v0 = vadd.f32 %v699_v46, %v2683_v55  ;;  %v741_v40 = vadd.f32 %v740_v54, %v351_v14  ;;  %v701_v39 = vpop.f32.mrb[5].mxu0  ;;  %v742_v61 = vpop.f32.mrb[5].mxu1 }
 0x2aa   :  { %v702_v6 = vadd.f32 %v701_v39, %v350_v3  ;;  %v743_v62 = vadd.f32 %v742_v61, %v352_v41  ;;  %v703_v48 = vpop.f32.mrb[6].mxu0  ;;  %v744_v4 = vpop.f32.mrb[6].mxu1 }
 0x2ab   :  { %v1506_v51 = vmul.f32 -1.442695, %v700_v0  ;;  %v704_v60 = vpop.f32.mrb[7].mxu0  ;;  %v745_v52 = vpop.f32.mrb[7].mxu1 }
 0x2ac   :  { %v1507_v58 = vmul.f32 -1.442695, %v702_v6  ;;  %v1508_v47 = vmul.f32 -1.442695, %v743_v62  ;;  %v2685_v60 = vld [vmem:[#allocation32_spill] sm:$0xff] }
 0x2ad   :  { %1620 = vpow2.f32 %v1506_v51  ;;  %v354_v52 = vadd.f32 %v2217_v9, %v2685_v60 }
 0x2ae   :  { %1622 = vpow2.f32 %v1507_v58  ;;  %v2686_v58 = vld [vmem:[#allocation33_spill] sm:$0xff] }
 0x2af   :  { %1624 = vpow2.f32 %v1508_v47  ;;  %v356_v47 = vadd.f32 %v2221_v11, %v2686_v58 }
 0x2b0   :  { %1626 = vtanh.f32 %v741_v40 }
 0x2b7   :  { %v1621_v2 = vpop.eup %1620 }
 0x2b8   :  { %v1623_v63 = vpop.eup %1622  ;;  %v750_v45 = vadd.f32 1.0, %v1621_v2  ;;  %v2687_v2 = vld [vmem:[#allocation34_spill] sm:$0xff] }
 0x2b9   :  { %v756_v46 = vadd.f32 1.0, %v1623_v63  ;;  %v1625_v14 = vpop.eup %1624 }
 0x2ba   :  { %1628 = vrcp.f32 %v750_v45  ;;  %v1627_v54 = vpop.eup %1626  ;;  %v763_v55 = vadd.f32 1.0, %v1625_v14 }
 0x2bb   :  { %1630 = vrcp.f32 %v756_v46 }
 0x2bc   :  { %1632 = vrcp.f32 %v763_v55 }
 0x2c4   :  { %v1629_v3 = vpop.eup %1628 }
 0x2c5   :  { %v1631_v8 = vpop.eup %1630  ;;  %v767_v41 = vmul.f32 %v1629_v3, %v1627_v54 }
 0x2c6   :  { %v766_v0 = vmul.f32 %v1631_v8, %v2228_v53  ;;  %v1633_v61 = vpop.eup %1632  ;;  %v2684_v53 = vld [vmem:[#allocation31_spill] sm:$0xff] }
 0x2c7   :  { %v355_v48 = vadd.f32 %v2213_v43, %v2684_v53 }
 0x2c8   :  { %v2273_v39 = vadd.f32 %v767_v41, %v766_v0 }
 0x2ca   :  { %1634 = vtanh.f32 %v2273_v39 }
 0x2d4   :  { %v1635_v6 = vpop.eup %1634 }
 0x2d5   :  { %v770_v62 = vmul.f32 %v1635_v6, %v1633_v61 }
 0x2d7   :  { %v771_v40 = vpack.c.bf16 %v770_v62, %v770_v62 }
 0x2d9   :  { %805 = vmatmul.mubr.bf16.vlgmr.msra.gmra.mrb[8].mxu0 %v771_v40  ;;  %846 = vmatmul.mubr.bf16.vlgmr.msra.gmra.mrb[8].mxu1 %v771_v40 }
 0x2da   :  { %880 = vmatpush1.bf16.msra.mxu0 %v1883_v12  ;;  %921 = vmatpush1.bf16.msra.mxu1 %v1885_v13 }
 0x2db   :  { %881 = vmatprep.subr.bf16.mxu0 %v1894_v15  ;;  %922 = vmatprep.subr.bf16.mxu1 %v1896_v16 }
 0x2dc   :  { %911 = vmatprep.mubr.bf16.mxu0 %v2659_v59  ;;  %952 = vmatprep.mubr.bf16.mxu1 %v2659_v59 }
 0x2de   :  { %882 = vmatpush1.bf16.msra.mxu0 %v1898_v17  ;;  %923 = vmatpush1.bf16.msra.mxu1 %v1900_v18 }
 0x2df   :  { %883 = vmatprep.subr.bf16.mxu0 %v1906_v19  ;;  %924 = vmatprep.subr.bf16.mxu1 %v1908_v20 }
 0x2e2   :  { %884 = vmatpush1.bf16.msra.mxu0 %v1910_v21  ;;  %925 = vmatpush1.bf16.msra.mxu1 %v1912_v22 }
 0x2e3   :  { %885 = vmatprep.subr.bf16.mxu0 %v1918_v23  ;;  %926 = vmatprep.subr.bf16.mxu1 %v1920_v24 }
 0x2e6   :  { %886 = vmatpush1.bf16.msra.mxu0 %v1922_v25  ;;  %927 = vmatpush1.bf16.msra.mxu1 %v1924_v26 }
 0x2e7   :  { %887 = vmatprep.subr.bf16.mxu0 %v1928_v27  ;;  %928 = vmatprep.subr.bf16.mxu1 %v1930_v28 }
 0x2ea   :  { %888 = vmatpush1.bf16.msra.mxu0 %v1933_v29  ;;  %929 = vmatpush1.bf16.msra.mxu1 %v1937_v30 }
 0x2eb   :  { %889 = vmatprep.subr.bf16.mxu0 %v1939_v31  ;;  %930 = vmatprep.subr.bf16.mxu1 %v1942_v32 }
 0x2ee   :  { %890 = vmatpush1.bf16.msra.mxu0 %v1945_v33  ;;  %931 = vmatpush1.bf16.msra.mxu1 %v1949_v34 }
 0x2ef   :  { %891 = vmatprep.subr.bf16.mxu0 %v1951_v35  ;;  %932 = vmatprep.subr.bf16.mxu1 %v2660_v50 }
 0x2f2   :  { %892 = vmatpush1.bf16.msra.mxu0 %v2661_v7  ;;  %933 = vmatpush1.bf16.msra.mxu1 %v2662_v37 }
 0x2f3   :  { %893 = vmatprep.subr.bf16.mxu0 %v2663_v36  ;;  %934 = vmatprep.subr.bf16.mxu1 %v2664_v42 }
 0x2f6   :  { %894 = vmatpush1.bf16.msra.mxu0 %v2665_v44  ;;  %935 = vmatpush1.bf16.msra.mxu1 %v2666_v10 }
 0x2f7   :  { %986 = vmatprep.subr.bf16.mxu0 %v2667_v5  ;;  %1027 = vmatprep.subr.bf16.mxu1 %v2668_v1 }
 0x3ac   :  { %v806_v4 = vpop.f32.mrb[8].mxu0  ;;  %v847_v51 = vpop.f32.mrb[8].mxu1 }
 0x3ad   :  { %v807_v63 = vadd.f32 %v806_v4, %v2687_v2  ;;  %v848_v45 = vadd.f32 %v847_v51, %v355_v48  ;;  %v808_v46 = vpop.f32.mrb[9].mxu0  ;;  %v849_v14 = vpop.f32.mrb[9].mxu1 }
 0x3ae   :  { %v809_v54 = vadd.f32 %v808_v46, %v354_v52  ;;  %v850_v5 = vadd.f32 %v849_v14, %v356_v47  ;;  %v810_v3 = vpop.f32.mrb[10].mxu0  ;;  %v851_v1 = vpop.f32.mrb[10].mxu1 }
 0x3af   :  { %v1509_v8 = vmul.f32 -1.442695, %v807_v63  ;;  %v811_v41 = vpop.f32.mrb[11].mxu0  ;;  %v852_v55 = vpop.f32.mrb[11].mxu1 }
 0x3b0   :  { %v1510_v0 = vmul.f32 -1.442695, %v809_v54  ;;  %v1511_v61 = vmul.f32 -1.442695, %v850_v5 }
 0x3b1   :  { %1636 = vpow2.f32 %v1509_v8 }
 0x3b2   :  { %1638 = vpow2.f32 %v1510_v0  ;;  %v2370_v0 = vld [vmem:[#allocation3] ss:$16 sps:$4 sm:$0xff]  }
 0x3b3   :  { %1640 = vpow2.f32 %v1511_v61  ;;  %v2373_v61 = vld [vmem:[#allocation3 + $0x8] ss:$16 sps:$4 sm:$0xff]  }
 0x3b4   :  { %1642 = vtanh.f32 %v848_v45 }
 0x3bb   :  { %v1637_v6 = vpop.eup %1636 }
 0x3bc   :  { %v1639_v62 = vpop.eup %1638  ;;  %v857_v40 = vadd.f32 1.0, %v1637_v6  ;;  %v2376_v6 = vld [vmem:[#allocation3 + $0x24] ss:$16 sps:$4 sm:$0xff]  }
 0x3bd   :  { %v863_v53 = vadd.f32 1.0, %v1639_v62  ;;  %v1641_v48 = vpop.eup %1640  ;;  %v2379_v62 = vld [vmem:[#allocation3 + $0x2c] ss:$16 sps:$4 sm:$0xff]  }
 0x3be   :  { %1644 = vrcp.f32 %v857_v40  ;;  %v1643_v4 = vpop.eup %1642  ;;  %v870_v58 = vadd.f32 1.0, %v1641_v48  ;;  %v2384_v40 = vld [vmem:[#allocation3 + $0x20] ss:$16 sps:$4 sm:$0xff]   ;;  %v2390_v48 = vld [vmem:[#allocation3 + $0x44] ss:$16 sps:$4 sm:$0xff]  }
 0x3bf   :  { %1646 = vrcp.f32 %v863_v53  ;;  %v2387_v53 = vld [vmem:[#allocation3 + $0x28] ss:$16 sps:$4 sm:$0xff]  }
 0x3c0   :  { %1648 = vrcp.f32 %v870_v58  ;;  %v2405_v58 = vld [vmem:[#allocation3 + $0x6c] ss:$16 sps:$4 sm:$0xff]  }
 0x3c8   :  { %v1645_v51 = vpop.eup %1644 }
 0x3c9   :  { %v1647_v60 = vpop.eup %1646  ;;  %v874_v52 = vmul.f32 %v1645_v51, %v1643_v4  ;;  %v2393_v4 = vld [vmem:[#allocation3 + $0x4c] ss:$16 sps:$4 sm:$0xff]   ;;  %v2396_v51 = vld [vmem:[#allocation3 + $0x40] ss:$16 sps:$4 sm:$0xff]  }
 0x3ca   :  { %v873_v47 = vmul.f32 %v1647_v60, %v2273_v39  ;;  %v1649_v63 = vpop.eup %1648  ;;  %v2399_v60 = vld [vmem:[#allocation3 + $0x48] ss:$16 sps:$4 sm:$0xff]  }
 0x3cc   :  { %v2318_v2 = vadd.f32 %v874_v52, %v873_v47  ;;  %v2402_v52 = vld [vmem:[#allocation3 + $0x64] ss:$16 sps:$4 sm:$0xff]   ;;  %v2408_v47 = vld [vmem:[#allocation3 + $0x60] ss:$16 sps:$4 sm:$0xff]  }
 0x3ce   :  { %1650 = vtanh.f32 %v2318_v2 }
 0x3d8   :  { %v1651_v46 = vpop.eup %1650 }
 0x3d9   :  { %v877_v14 = vmul.f32 %v1651_v46, %v1649_v63  ;;  %v2414_v63 = vld [vmem:[#allocation3 + $0x84] ss:$16 sps:$4 sm:$0xff]   ;;  %v2417_v46 = vld [vmem:[#allocation3 + $0x8c] ss:$16 sps:$4 sm:$0xff]  }
 0x3db   :  { %v878_v45 = vpack.c.bf16 %v877_v14, %v877_v14  ;;  %v2420_v14 = vld [vmem:[#allocation3 + $0x80] ss:$16 sps:$4 sm:$0xff]  }
 0x3dd   :  { %912 = vmatmul.mubr.bf16.vlgmr.msra.gmra.mrb[12].mxu0 %v878_v45  ;;  %953 = vmatmul.mubr.bf16.vlgmr.msra.gmra.mrb[12].mxu1 %v878_v45  ;;  %v2423_v45 = vld [vmem:[#allocation3 + $0x88] ss:$16 sps:$4 sm:$0xff]  }
 0x3de   :  { %987 = vmatpush1.bf16.msra.mxu0 %v1883_v12  ;;  %1028 = vmatpush1.bf16.msra.mxu1 %v1885_v13  ;;  %v2353_v12 = vld [vmem:[#allocation3 + $0x4] ss:$16 sps:$4 sm:$0xff]   ;;  %v2356_v13 = vld [vmem:[#allocation3 + $0xc] ss:$16 sps:$4 sm:$0xff]  }
 0x3df   :  { %988 = vmatprep.subr.bf16.mxu0 %v1894_v15  ;;  %1029 = vmatprep.subr.bf16.mxu1 %v1896_v16  ;;  %v2688_v15 = vld [vmem:[#allocation35_spill] sm:$0xff] }
 0x3e0   :  { %1018 = vmatprep.mubr.bf16.mxu0 %v2659_v59  ;;  %1059 = vmatprep.mubr.bf16.mxu1 %v2659_v59  ;;  %v359_v16 = vadd.f32 %v2213_v43, %v2688_v15  ;;  %v2426_v15 = vld [vmem:[#allocation3 + $0xa4] ss:$16 sps:$4 sm:$0xff]  }
 0x3e2   :  { %989 = vmatpush1.bf16.msra.mxu0 %v1898_v17  ;;  %1030 = vmatpush1.bf16.msra.mxu1 %v1900_v18 }
 0x3e3   :  { %990 = vmatprep.subr.bf16.mxu0 %v1906_v19  ;;  %1031 = vmatprep.subr.bf16.mxu1 %v1908_v20  ;;  %v2689_v19 = vld [vmem:[#allocation36_spill] sm:$0xff] }
 0x3e4   :  { %v358_v20 = vadd.f32 %v2217_v9, %v2689_v19  ;;  %v2438_v19 = vld [vmem:[#allocation3 + $0xc4] ss:$16 sps:$4 sm:$0xff]  }
 0x3e6   :  { %991 = vmatpush1.bf16.msra.mxu0 %v1910_v21  ;;  %1032 = vmatpush1.bf16.msra.mxu1 %v1912_v22  ;;  %v360_v21 = vadd.f32 %v2221_v11, %v2133_v38  ;;  %v2690_v22 = vld [vmem:[#allocation37_spill] sm:$0xff] }
 0x3e7   :  { %992 = vmatprep.subr.bf16.mxu0 %v1918_v23  ;;  %1033 = vmatprep.subr.bf16.mxu1 %v1920_v24 }
 0x3ea   :  { %993 = vmatpush1.bf16.msra.mxu0 %v1922_v25  ;;  %1034 = vmatpush1.bf16.msra.mxu1 %v1924_v26 }
 0x3eb   :  { %994 = vmatprep.subr.bf16.mxu0 %v1928_v27  ;;  %1035 = vmatprep.subr.bf16.mxu1 %v1930_v28 }
 0x3ee   :  { %995 = vmatpush1.bf16.msra.mxu0 %v1933_v29  ;;  %1036 = vmatpush1.bf16.msra.mxu1 %v1937_v30 }
 0x3ef   :  { %996 = vmatprep.subr.bf16.mxu0 %v1939_v31  ;;  %1037 = vmatprep.subr.bf16.mxu1 %v1942_v32 }
 0x3f2   :  { %997 = vmatpush1.bf16.msra.mxu0 %v1945_v33  ;;  %1038 = vmatpush1.bf16.msra.mxu1 %v1949_v34 }
 0x3f3   :  { %998 = vmatprep.subr.bf16.mxu0 %v1951_v35  ;;  %1039 = vmatprep.subr.bf16.mxu1 %v2660_v50 }
 0x3f6   :  { %999 = vmatpush1.bf16.msra.mxu0 %v2661_v7  ;;  %1040 = vmatpush1.bf16.msra.mxu1 %v2662_v37 }
 0x3f7   :  { %1000 = vmatprep.subr.bf16.mxu0 %v2663_v36  ;;  %1041 = vmatprep.subr.bf16.mxu1 %v2664_v42 }
 0x3fa   :  { %1001 = vmatpush1.bf16.msra.mxu0 %v2665_v44  ;;  %1042 = vmatpush1.bf16.msra.mxu1 %v2666_v10 }
 0x3fb   :  { %1093 = vmatprep.subr.bf16.mxu0 %v2353_v12  ;;  %1134 = vmatprep.subr.bf16.mxu1 %v2356_v13 }
 0x4b0   :  { %v913_v17 = vpop.f32.mrb[12].mxu0  ;;  %v954_v18 = vpop.f32.mrb[12].mxu1 }
 0x4b1   :  { %v914_v23 = vadd.f32 %v913_v17, %v2690_v22  ;;  %v955_v24 = vadd.f32 %v954_v18, %v359_v16  ;;  %v915_v25 = vpop.f32.mrb[13].mxu0  ;;  %v956_v26 = vpop.f32.mrb[13].mxu1  ;;  %v2429_v16 = vld [vmem:[#allocation3 + $0xac] ss:$16 sps:$4 sm:$0xff]   ;;  %v2432_v17 = vld [vmem:[#allocation3 + $0xa0] ss:$16 sps:$4 sm:$0xff]  }
 0x4b2   :  { %v916_v27 = vadd.f32 %v915_v25, %v358_v20  ;;  %v957_v28 = vadd.f32 %v956_v26, %v360_v21  ;;  %v917_v29 = vpop.f32.mrb[14].mxu0  ;;  %v958_v30 = vpop.f32.mrb[14].mxu1  ;;  %v2435_v18 = vld [vmem:[#allocation3 + $0xa8] ss:$16 sps:$4 sm:$0xff]   ;;  %v2441_v20 = vld [vmem:[#allocation3 + $0xcc] ss:$16 sps:$4 sm:$0xff]  }
 0x4b3   :  { %v1512_v31 = vmul.f32 -1.442695, %v914_v23  ;;  %v918_v32 = vpop.f32.mrb[15].mxu0  ;;  %v959_v33 = vpop.f32.mrb[15].mxu1  ;;  %v2444_v21 = vld [vmem:[#allocation3 + $0xc0] ss:$16 sps:$4 sm:$0xff]   ;;  %v362_v30 = vadd.f32 %v2217_v9, %v2137_v49 }
 0x4b4   :  { %v1513_v34 = vmul.f32 -1.442695, %v916_v27  ;;  %v1514_v35 = vmul.f32 -1.442695, %v957_v28  ;;  %v2447_v22 = vld [vmem:[#allocation3 + $0xc8] ss:$16 sps:$4 sm:$0xff]   ;;  %v363_v27 = vadd.f32 %v2213_v43, %v2135_v56 }
 0x4b5   :  { %1652 = vpow2.f32 %v1512_v31  ;;  %v2450_v23 = vld [vmem:[#allocation3 + $0xe4] ss:$16 sps:$4 sm:$0xff]   ;;  %v2456_v25 = vld [vmem:[#allocation3 + $0xe0] ss:$16 sps:$4 sm:$0xff]   ;;  %v2459_v26 = vld [vmem:[#allocation3 + $0xe8] ss:$16 sps:$4 sm:$0xff]   ;;  %v364_v31 = vadd.f32 %v2221_v11, %v2139_v57 }
 0x4b6   :  { %1654 = vpow2.f32 %v1513_v34  ;;  %v2691_v32 = vld [vmem:[#allocation40_spill] sm:$0xff] }
 0x4b7   :  { %1656 = vpow2.f32 %v1514_v35 }
 0x4b8   :  { %1658 = vtanh.f32 %v955_v24  ;;  %v2453_v24 = vld [vmem:[#allocation3 + $0xec] ss:$16 sps:$4 sm:$0xff]  }
 0x4bf   :  { %v1653_v50 = vpop.eup %1652 }
 0x4c0   :  { %v1655_v7 = vpop.eup %1654  ;;  %v964_v37 = vadd.f32 1.0, %v1653_v50 }
 0x4c1   :  { %v970_v38 = vadd.f32 1.0, %v1655_v7  ;;  %v1657_v36 = vpop.eup %1656 }
 0x4c2   :  { %1660 = vrcp.f32 %v964_v37  ;;  %v1659_v42 = vpop.eup %1658  ;;  %v977_v54 = vadd.f32 1.0, %v1657_v36 }
 0x4c3   :  { %1662 = vrcp.f32 %v970_v38 }
 0x4c4   :  { %1664 = vrcp.f32 %v977_v54 }
 0x4cc   :  { %v1661_v44 = vpop.eup %1660 }
 0x4cd   :  { %v1663_v10 = vpop.eup %1662  ;;  %v981_v39 = vmul.f32 %v1661_v44, %v1659_v42 }
 0x4ce   :  { %v980_v5 = vmul.f32 %v1663_v10, %v2318_v2  ;;  %v1665_v1 = vpop.eup %1664  ;;  %v2411_v2 = vld [vmem:[#allocation3 + $0x68] ss:$16 sps:$4 sm:$0xff]  }
 0x4d0   :  { %v2367_v3 = vadd.f32 %v981_v39, %v980_v5 }
 0x4d2   :  { %1666 = vtanh.f32 %v2367_v3 }
 0x4dc   :  { %v1667_v8 = vpop.eup %1666 }
 0x4dd   :  { %v984_v41 = vmul.f32 %v1667_v8, %v1665_v1 }
 0x4df   :  { %v985_v55 = vpack.c.bf16 %v984_v41, %v984_v41 }
 0x4e1   :  { %1019 = vmatmul.mubr.bf16.vlgmr.msra.gmra.mrb[16].mxu0 %v985_v55  ;;  %1060 = vmatmul.mubr.bf16.vlgmr.msra.gmra.mrb[16].mxu1 %v985_v55 }
 0x4e2   :  { %1094 = vmatpush1.bf16.msra.mxu0 %v2370_v0  ;;  %1135 = vmatpush1.bf16.msra.mxu1 %v2373_v61 }
 0x4e3   :  { %1095 = vmatprep.subr.bf16.mxu0 %v2376_v6  ;;  %1136 = vmatprep.subr.bf16.mxu1 %v2379_v62 }
 0x4e4   :  { %1125 = vmatprep.mubr.bf16.mxu0 %v2659_v59  ;;  %1166 = vmatprep.mubr.bf16.mxu1 %v2659_v59 }
 0x4e6   :  { %1096 = vmatpush1.bf16.msra.mxu0 %v2384_v40  ;;  %1137 = vmatpush1.bf16.msra.mxu1 %v2387_v53 }
 0x4e7   :  { %1097 = vmatprep.subr.bf16.mxu0 %v2390_v48  ;;  %1138 = vmatprep.subr.bf16.mxu1 %v2393_v4 }
 0x4ea   :  { %1098 = vmatpush1.bf16.msra.mxu0 %v2396_v51  ;;  %1139 = vmatpush1.bf16.msra.mxu1 %v2399_v60 }
 0x4eb   :  { %1099 = vmatprep.subr.bf16.mxu0 %v2402_v52  ;;  %1140 = vmatprep.subr.bf16.mxu1 %v2405_v58 }
 0x4ee   :  { %1100 = vmatpush1.bf16.msra.mxu0 %v2408_v47  ;;  %1141 = vmatpush1.bf16.msra.mxu1 %v2411_v2 }
 0x4ef   :  { %1101 = vmatprep.subr.bf16.mxu0 %v2414_v63  ;;  %1142 = vmatprep.subr.bf16.mxu1 %v2417_v46 }
 0x4f2   :  { %1102 = vmatpush1.bf16.msra.mxu0 %v2420_v14  ;;  %1143 = vmatpush1.bf16.msra.mxu1 %v2423_v45 }
 0x4f3   :  { %1103 = vmatprep.subr.bf16.mxu0 %v2426_v15  ;;  %1144 = vmatprep.subr.bf16.mxu1 %v2429_v16 }
 0x4f6   :  { %1104 = vmatpush1.bf16.msra.mxu0 %v2432_v17  ;;  %1145 = vmatpush1.bf16.msra.mxu1 %v2435_v18 }
 0x4f7   :  { %1105 = vmatprep.subr.bf16.mxu0 %v2438_v19  ;;  %1146 = vmatprep.subr.bf16.mxu1 %v2441_v20 }
 0x4fa   :  { %1106 = vmatpush1.bf16.msra.mxu0 %v2444_v21  ;;  %1147 = vmatpush1.bf16.msra.mxu1 %v2447_v22 }
 0x4fb   :  { %1107 = vmatprep.subr.bf16.mxu0 %v2450_v23  ;;  %1148 = vmatprep.subr.bf16.mxu1 %v2453_v24 }
 0x4fe   :  { %1108 = vmatpush1.bf16.msra.mxu0 %v2456_v25  ;;  %1149 = vmatpush1.bf16.msra.mxu1 %v2459_v26 }
 0x4ff   :  { %1200 = vmatprep.subr.bf16.mxu0 %v2353_v12  ;;  %1241 = vmatprep.subr.bf16.mxu1 %v2356_v13 }
 0x5b4   :  { %v1020_v28 = vpop.f32.mrb[16].mxu0  ;;  %v1061_v29 = vpop.f32.mrb[16].mxu1 }
 0x5b5   :  { %v1021_v33 = vadd.f32 %v1020_v28, %v2691_v32  ;;  %v1062_v34 = vadd.f32 %v1061_v29, %v363_v27  ;;  %v1022_v35 = vpop.f32.mrb[17].mxu0  ;;  %v1063_v50 = vpop.f32.mrb[17].mxu1 }
 0x5b6   :  { %v1023_v7 = vadd.f32 %v1022_v35, %v362_v30  ;;  %v1064_v37 = vadd.f32 %v1063_v50, %v364_v31  ;;  %v1024_v38 = vpop.f32.mrb[18].mxu0  ;;  %v1065_v36 = vpop.f32.mrb[18].mxu1 }
 0x5b7   :  { %v1515_v42 = vmul.f32 -1.442695, %v1021_v33  ;;  %v1025_v44 = vpop.f32.mrb[19].mxu0  ;;  %v1066_v56 = vpop.f32.mrb[19].mxu1  ;;  %v2694_v36 = vld [vmem:[#allocation42_spill] sm:$0xff] }
 0x5b8   :  { %v1516_v10 = vmul.f32 -1.442695, %v1023_v7  ;;  %v1517_v39 = vmul.f32 -1.442695, %v1064_v37  ;;  %v2693_v37 = vld [vmem:[#allocation39_spill] sm:$0xff]  ;;  %v2695_v44 = vld [vmem:[#allocation41_spill] sm:$0xff] }
 0x5b9   :  { %1668 = vpow2.f32 %v1515_v42  ;;  %v366_v38 = vadd.f32 %v2217_v9, %v2693_v37  ;;  %v368_v42 = vadd.f32 %v2221_v11, %v2694_v36 }
 0x5ba   :  { %1670 = vpow2.f32 %v1516_v10 }
 0x5bb   :  { %1672 = vpow2.f32 %v1517_v39 }
 0x5bc   :  { %1674 = vtanh.f32 %v1062_v34 }
 0x5c3   :  { %v1669_v49 = vpop.eup %1668 }
 0x5c4   :  { %v1671_v54 = vpop.eup %1670  ;;  %v1071_v5 = vadd.f32 1.0, %v1669_v49 }
 0x5c5   :  { %v1077_v57 = vadd.f32 1.0, %v1671_v54  ;;  %v1673_v1 = vpop.eup %1672 }
 0x5c6   :  { %1676 = vrcp.f32 %v1071_v5  ;;  %v1675_v8 = vpop.eup %1674  ;;  %v1084_v28 = vadd.f32 1.0, %v1673_v1 }
 0x5c7   :  { %1678 = vrcp.f32 %v1077_v57 }
 0x5c8   :  { %1680 = vrcp.f32 %v1084_v28 }
 0x5d0   :  { %v1677_v41 = vpop.eup %1676 }
 0x5d1   :  { %v1679_v55 = vpop.eup %1678  ;;  %v1088_v27 = vmul.f32 %v1677_v41, %v1675_v8 }
 0x5d2   :  { %v1087_v29 = vmul.f32 %v1679_v55, %v2367_v3  ;;  %v1681_v31 = vpop.eup %1680  ;;  %v2692_v3 = vld [vmem:[#allocation38_spill] sm:$0xff] }
 0x5d3   :  { %v367_v35 = vadd.f32 %v2213_v43, %v2692_v3 }
 0x5d4   :  { %v2472_v30 = vadd.f32 %v1088_v27, %v1087_v29 }
 0x5d6   :  { %1682 = vtanh.f32 %v2472_v30 }
 0x5e0   :  { %v1683_v32 = vpop.eup %1682 }
 0x5e1   :  { %v1091_v33 = vmul.f32 %v1683_v32, %v1681_v31 }
 0x5e3   :  { %v1092_v34 = vpack.c.bf16 %v1091_v33, %v1091_v33 }
 0x5e5   :  { %1126 = vmatmul.mubr.bf16.vlgmr.msra.gmra.mrb[20].mxu0 %v1092_v34  ;;  %1167 = vmatmul.mubr.bf16.vlgmr.msra.gmra.mrb[20].mxu1 %v1092_v34 }
 0x5e6   :  { %1201 = vmatpush1.bf16.msra.mxu0 %v2370_v0  ;;  %1242 = vmatpush1.bf16.msra.mxu1 %v2373_v61 }
 0x5e7   :  { %1202 = vmatprep.subr.bf16.mxu0 %v2376_v6  ;;  %1243 = vmatprep.subr.bf16.mxu1 %v2379_v62 }
 0x5e8   :  { %1232 = vmatprep.mubr.bf16.mxu0 %v2659_v59  ;;  %1273 = vmatprep.mubr.bf16.mxu1 %v2659_v59 }
 0x5ea   :  { %1203 = vmatpush1.bf16.msra.mxu0 %v2384_v40  ;;  %1244 = vmatpush1.bf16.msra.mxu1 %v2387_v53 }
 0x5eb   :  { %1204 = vmatprep.subr.bf16.mxu0 %v2390_v48  ;;  %1245 = vmatprep.subr.bf16.mxu1 %v2393_v4 }
 0x5ee   :  { %1205 = vmatpush1.bf16.msra.mxu0 %v2396_v51  ;;  %1246 = vmatpush1.bf16.msra.mxu1 %v2399_v60 }
 0x5ef   :  { %1206 = vmatprep.subr.bf16.mxu0 %v2402_v52  ;;  %1247 = vmatprep.subr.bf16.mxu1 %v2405_v58 }
 0x5f2   :  { %1207 = vmatpush1.bf16.msra.mxu0 %v2408_v47  ;;  %1248 = vmatpush1.bf16.msra.mxu1 %v2411_v2 }
 0x5f3   :  { %1208 = vmatprep.subr.bf16.mxu0 %v2414_v63  ;;  %1249 = vmatprep.subr.bf16.mxu1 %v2417_v46 }
 0x5f6   :  { %1209 = vmatpush1.bf16.msra.mxu0 %v2420_v14  ;;  %1250 = vmatpush1.bf16.msra.mxu1 %v2423_v45 }
 0x5f7   :  { %1210 = vmatprep.subr.bf16.mxu0 %v2426_v15  ;;  %1251 = vmatprep.subr.bf16.mxu1 %v2429_v16 }
 0x5fa   :  { %1211 = vmatpush1.bf16.msra.mxu0 %v2432_v17  ;;  %1252 = vmatpush1.bf16.msra.mxu1 %v2435_v18 }
 0x5fb   :  { %1212 = vmatprep.subr.bf16.mxu0 %v2438_v19  ;;  %1253 = vmatprep.subr.bf16.mxu1 %v2441_v20 }
 0x5fe   :  { %1213 = vmatpush1.bf16.msra.mxu0 %v2444_v21  ;;  %1254 = vmatpush1.bf16.msra.mxu1 %v2447_v22 }
 0x5ff   :  { %1214 = vmatprep.subr.bf16.mxu0 %v2450_v23  ;;  %1255 = vmatprep.subr.bf16.mxu1 %v2453_v24 }
 0x602   :  { %1215 = vmatpush1.bf16.msra.mxu0 %v2456_v25  ;;  %1256 = vmatpush1.bf16.msra.mxu1 %v2459_v26 }
 0x603   :  { %1328 = vmatprep.subr.bf16.mxu0 %v2353_v12  ;;  %1369 = vmatprep.subr.bf16.mxu1 %v2356_v13 }
 0x6b8   :  { %v1127_v50 = vpop.f32.mrb[20].mxu0  ;;  %v1168_v7 = vpop.f32.mrb[20].mxu1 }
 0x6b9   :  { %v1128_v56 = vadd.f32 %v1127_v50, %v2695_v44  ;;  %v1169_v10 = vadd.f32 %v1168_v7, %v367_v35  ;;  %v1129_v39 = vpop.f32.mrb[21].mxu0  ;;  %v1170_v49 = vpop.f32.mrb[21].mxu1 }
 0x6ba   :  { %v1130_v54 = vadd.f32 %v1129_v39, %v366_v38  ;;  %v1171_v12 = vadd.f32 %v1170_v49, %v368_v42  ;;  %v1131_v5 = vpop.f32.mrb[22].mxu0  ;;  %v1172_v13 = vpop.f32.mrb[22].mxu1  ;;  %v1768_v49 = vld [vmem:[%s2577_s4] sm:$0xf] }
 0x6bb   :  { %v1518_v57 = vmul.f32 -1.442695, %v1128_v56  ;;  %v1132_v1 = vpop.f32.mrb[23].mxu0  ;;  %v1173_v8 = vpop.f32.mrb[23].mxu1  ;;  %v2701_v5 = vld [vmem:[#allocation16_spill] sm:$0xff] }
 0x6bc   :  { %v1519_v41 = vmul.f32 -1.442695, %v1130_v54  ;;  %v1520_v55 = vmul.f32 -1.442695, %v1171_v12  ;;  %v2700_v54 = vld [vmem:[#allocation15_spill] sm:$0xff]  ;;  %v1315_v13 = vrot.slane %v1768_v49, %v2701_v5 }
 0x6bd   :  { %1684 = vpow2.f32 %v1518_v57  ;;  %v1311_v12 = vrot.slane %v1768_v49, %v2700_v54 }
 0x6be   :  { %1686 = vpow2.f32 %v1519_v41 }
 0x6bf   :  { %1688 = vpow2.f32 %v1520_v55 }
 0x6c0   :  { %1690 = vtanh.f32 %v1169_v10 }
 0x6c7   :  { %v1685_v27 = vpop.eup %1684 }
 0x6c8   :  { %v1687_v28 = vpop.eup %1686  ;;  %v1178_v29 = vadd.f32 1.0, %v1685_v27 }
 0x6c9   :  { %v1184_v31 = vadd.f32 1.0, %v1687_v28  ;;  %v1689_v32 = vpop.eup %1688 }
 0x6ca   :  { %1692 = vrcp.f32 %v1178_v29  ;;  %v1691_v33 = vpop.eup %1690  ;;  %v1191_v50 = vadd.f32 1.0, %v1689_v32 }
 0x6cb   :  { %1694 = vrcp.f32 %v1184_v31 }
 0x6cc   :  { %1696 = vrcp.f32 %v1191_v50 }
 0x6d4   :  { %v1693_v34 = vpop.eup %1692 }
 0x6d5   :  { %v1695_v3 = vpop.eup %1694  ;;  %v1195_v35 = vmul.f32 %v1693_v34, %v1691_v33 }
 0x6d6   :  { %v1194_v7 = vmul.f32 %v1695_v3, %v2472_v30  ;;  %v1697_v38 = vpop.eup %1696  ;;  %v2702_v3 = vld [vmem:[#allocation17_spill] sm:$0xff] }
 0x6d8   :  { %v2517_v37 = vadd.f32 %v1195_v35, %v1194_v7  ;;  %v1323_v35 = vrot.slane %v1768_v49, %v2702_v3  ;;  %v2703_v7 = vld [vmem:[#allocation19_spill] sm:$0xff] }
 0x6da   :  { %1698 = vtanh.f32 %v2517_v37 }
 0x6e4   :  { %v1699_v36 = vpop.eup %1698 }
 0x6e5   :  { %v1198_v42 = vmul.f32 %v1699_v36, %v1697_v38 }
 0x6e7   :  { %v1199_v44 = vpack.c.bf16 %v1198_v42, %v1198_v42 }
 0x6e9   :  { %1233 = vmatmul.mubr.bf16.vlgmr.msra.gmra.mrb[24].mxu0 %v1199_v44  ;;  %1274 = vmatmul.mubr.bf16.vlgmr.msra.gmra.mrb[24].mxu1 %v1199_v44 }
 0x6ea   :  { %1329 = vmatpush1.bf16.msra.mxu0 %v2370_v0  ;;  %1370 = vmatpush1.bf16.msra.mxu1 %v2373_v61 }
 0x6eb   :  { %1330 = vmatprep.subr.bf16.mxu0 %v2376_v6  ;;  %1371 = vmatprep.subr.bf16.mxu1 %v2379_v62  ;;  %v2697_v62 = vld [vmem:[#allocation44_spill] sm:$0xff] }
 0x6ec   :  { %1360 = vmatprep.mubr.bf16.mxu0 %v2659_v59  ;;  %1401 = vmatprep.mubr.bf16.mxu1 %v2659_v59  ;;  %v2696_v59 = vld [vmem:[#allocation43_spill] sm:$0xff] }
 0x6ed   :  { %v371_v0 = vadd.f32 %v2213_v43, %v2696_v59 }
 0x6ee   :  { %1331 = vmatpush1.bf16.msra.mxu0 %v2384_v40  ;;  %1372 = vmatpush1.bf16.msra.mxu1 %v2387_v53  ;;  %v370_v40 = vadd.f32 %v2217_v9, %v2697_v62  ;;  %v2698_v53 = vld [vmem:[#allocation45_spill] sm:$0xff] }
 0x6ef   :  { %1332 = vmatprep.subr.bf16.mxu0 %v2390_v48  ;;  %1373 = vmatprep.subr.bf16.mxu1 %v2393_v4  ;;  %v372_v48 = vadd.f32 %v2221_v11, %v2698_v53  ;;  %v2699_v4 = vld [vmem:[#allocation46_spill] sm:$0xff] }
 0x6f2   :  { %1333 = vmatpush1.bf16.msra.mxu0 %v2396_v51  ;;  %1374 = vmatpush1.bf16.msra.mxu1 %v2399_v60 }
 0x6f3   :  { %1334 = vmatprep.subr.bf16.mxu0 %v2402_v52  ;;  %1375 = vmatprep.subr.bf16.mxu1 %v2405_v58 }
 0x6f6   :  { %1335 = vmatpush1.bf16.msra.mxu0 %v2408_v47  ;;  %1376 = vmatpush1.bf16.msra.mxu1 %v2411_v2 }
 0x6f7   :  { %1336 = vmatprep.subr.bf16.mxu0 %v2414_v63  ;;  %1377 = vmatprep.subr.bf16.mxu1 %v2417_v46 }
 0x6fa   :  { %1337 = vmatpush1.bf16.msra.mxu0 %v2420_v14  ;;  %1378 = vmatpush1.bf16.msra.mxu1 %v2423_v45 }
 0x6fb   :  { %1338 = vmatprep.subr.bf16.mxu0 %v2426_v15  ;;  %1379 = vmatprep.subr.bf16.mxu1 %v2429_v16 }
 0x6fe   :  { %1339 = vmatpush1.bf16.msra.mxu0 %v2432_v17  ;;  %1380 = vmatpush1.bf16.msra.mxu1 %v2435_v18 }
 0x6ff   :  { %1340 = vmatprep.subr.bf16.mxu0 %v2438_v19  ;;  %1381 = vmatprep.subr.bf16.mxu1 %v2441_v20 }
 0x702   :  { %1341 = vmatpush1.bf16.msra.mxu0 %v2444_v21  ;;  %1382 = vmatpush1.bf16.msra.mxu1 %v2447_v22 }
 0x703   :  { %1342 = vmatprep.subr.bf16.mxu0 %v2450_v23  ;;  %1383 = vmatprep.subr.bf16.mxu1 %v2453_v24 }
 0x706   :  { %1343 = vmatpush1.bf16.msra.mxu0 %v2456_v25  ;;  %1384 = vmatpush1.bf16.msra.mxu1 %v2459_v26 }
 0x7bc   :  { %v1234_v61 = vpop.f32.mrb[24].mxu0  ;;  %v1275_v6 = vpop.f32.mrb[24].mxu1 }
 0x7bd   :  { %v1235_v51 = vadd.f32 %v1234_v61, %v2699_v4  ;;  %v1276_v60 = vadd.f32 %v1275_v6, %v371_v0  ;;  %v1236_v52 = vpop.f32.mrb[25].mxu0  ;;  %v1277_v58 = vpop.f32.mrb[25].mxu1 }
 0x7be   :  { %v1237_v47 = vadd.f32 %v1236_v52, %v370_v40  ;;  %v1278_v2 = vadd.f32 %v1277_v58, %v372_v48  ;;  %v1238_v63 = vpop.f32.mrb[26].mxu0  ;;  %v1279_v46 = vpop.f32.mrb[26].mxu1  ;;  %v1527_v58 = vld [vmem:[%s2578_s5] ss:$0 sm:$0xff] }
 0x7bf   :  { %v1521_v14 = vmul.f32 -1.442695, %v1235_v51  ;;  %v1239_v45 = vpop.f32.mrb[27].mxu0  ;;  %v1280_v43 = vpop.f32.mrb[27].mxu1  ;;  %v1528_v46 = vld [vmem:[#allocation2] ss:$0 sm:$0xff] }
 0x7c0   :  { %v1522_v15 = vmul.f32 -1.442695, %v1237_v47  ;;  %v1523_v16 = vmul.f32 -1.442695, %v1278_v2 }
 0x7c1   :  { %1700 = vpow2.f32 %v1521_v14 }
 0x7c2   :  { %1702 = vpow2.f32 %v1522_v15 }
 0x7c3   :  { %1704 = vpow2.f32 %v1523_v16 }
 0x7c4   :  { %1706 = vtanh.f32 %v1276_v60 }
 0x7cb   :  { %v1701_v9 = vpop.eup %1700 }
 0x7cc   :  { %v1703_v17 = vpop.eup %1702  ;;  %v1285_v18 = vadd.f32 1.0, %v1701_v9 }
 0x7cd   :  { %v1291_v11 = vadd.f32 1.0, %v1703_v17  ;;  %v1705_v19 = vpop.eup %1704 }
 0x7ce   :  { %1708 = vrcp.f32 %v1285_v18  ;;  %v1707_v20 = vpop.eup %1706  ;;  %v1298_v24 = vadd.f32 1.0, %v1705_v19 }
 0x7cf   :  { %1710 = vrcp.f32 %v1291_v11 }
 0x7d0   :  { %1712 = vrcp.f32 %v1298_v24 }
 0x7d8   :  { %v1709_v21 = vpop.eup %1708 }
 0x7d9   :  { %v1711_v22 = vpop.eup %1710  ;;  %v1302_v23 = vmul.f32 %v1709_v21, %v1707_v20 }
 0x7da   :  { %v1301_v25 = vmul.f32 %v1711_v22, %v2517_v37  ;;  %v1713_v30 = vpop.eup %1712  ;;  %v1319_v37 = vrot.slane %v1768_v49, %v2703_v7 }
 0x7dc   :  { %v1303_v26 = vadd.f32 %v1302_v23, %v1301_v25 }
 0x7de   :  { %1714 = vtanh.f32 %v1303_v26 }
 0x7e8   :  { %v1715_v56 = vpop.eup %1714 }
 0x7e9   :  { %v1305_v10 = vmul.f32 %v1715_v56, %v1713_v30 }
 0x7eb   :  { %v1306_v39 = vpack.c.bf16 %v1305_v10, %v1305_v10 }
 0x7ed   :  { %1361 = vmatmul.mubr.bf16.vlgmr.msra.gmra.mrb[28].mxu0 %v1306_v39  ;;  %1402 = vmatmul.mubr.bf16.vlgmr.msra.gmra.mrb[28].mxu1 %v1306_v39 }
 0x8c0   :  { %v1362_v57 = vpop.f32.mrb[28].mxu0  ;;  %v1403_v1 = vpop.f32.mrb[28].mxu1 }
 0x8c1   :  { %v1363_v8 = vadd.f32 %v1362_v57, %v1311_v12  ;;  %v1364_v41 = vpop.f32.mrb[29].mxu0  ;;  %v1405_v55 = vpop.f32.mrb[29].mxu1  ;;  %v1404_v36 = vadd.f32 %v1403_v1, %v1319_v37 }
 0x8c2   :  { %v1365_v27 = vadd.f32 %v1364_v41, %v1315_v13  ;;  %v1366_v28 = vpop.f32.mrb[30].mxu0  ;;  %v1407_v29 = vpop.f32.mrb[30].mxu1  ;;  %v1406_v50 = vadd.f32 %v1405_v55, %v1323_v35 }
 0x8c3   :  { %v1524_v31 = vmul.f32 -1.442695, %v1363_v8  ;;  %v1367_v32 = vpop.f32.mrb[31].mxu0  ;;  %v1408_v33 = vpop.f32.mrb[31].mxu1 }
 0x8c4   :  { %v1525_v34 = vmul.f32 -1.442695, %v1365_v27  ;;  %v1526_v38 = vmul.f32 -1.442695, %v1406_v50 }
 0x8c5   :  { %1716 = vpow2.f32 %v1524_v31 }
 0x8c6   :  { %1718 = vpow2.f32 %v1525_v34 }
 0x8c7   :  { %1720 = vpow2.f32 %v1526_v38 }
 0x8c8   :  { %1722 = vtanh.f32 %v1404_v36 }
 0x8cf   :  { %v1717_v42 = vpop.eup %1716 }
 0x8d0   :  { %v1719_v44 = vpop.eup %1718  ;;  %v1413_v59 = vadd.f32 1.0, %v1717_v42 }
 0x8d1   :  { %v1419_v0 = vadd.f32 1.0, %v1719_v44  ;;  %v1721_v61 = vpop.eup %1720 }
 0x8d2   :  { %1724 = vrcp.f32 %v1413_v59  ;;  %v1723_v6 = vpop.eup %1722  ;;  %v1426_v48 = vadd.f32 1.0, %v1721_v61 }
 0x8d3   :  { %1726 = vrcp.f32 %v1419_v0 }
 0x8d4   :  { %1728 = vrcp.f32 %v1426_v48 }
 0x8dc   :  { %v1725_v62 = vpop.eup %1724 }
 0x8dd   :  { %v1727_v40 = vpop.eup %1726  ;;  %v1430_v53 = vmul.f32 %v1725_v62, %v1723_v6 }
 0x8de   :  { %v1429_v4 = vmul.f32 %v1727_v40, %v1303_v26  ;;  %v1729_v60 = vpop.eup %1728 }
 0x8e0   :  { %v1431_v51 = vadd.f32 %v1430_v53, %v1429_v4 }
 0x8e2   :  { %1730 = vtanh.f32 %v1431_v51 }
 0x8ec   :  { %v1731_v52 = vpop.eup %1730 }
 0x8ed   :  { %v1433_v47 = vmul.f32 %v1731_v52, %v1729_v60 }
 0x8ef   :  { %v1441_v2 = vmul.f32 %v1527_v58, %v1433_v47 }
 0x8f1   :  { %v1443_v63 = vsel %vm1442_vm0, %v1441_v2, 0.0 }
 0x8f2   :  { %1444 = vadd.xlane.f32.xlu1 %v1443_v63 }
 0x97f   :  { %v1445_v14 = vpop.xlane.xlu1 %1444 }
 0x980   :  { %v1453_v45 = vadd.f32 %v1528_v46, %v1445_v14 }
 0x982   :  { %v1529_v43 = vmul.f32 -1.442695, %v1453_v45 }
 0x984   :  { %1732 = vpow2.f32 %v1529_v43 }
 0x98e   :  { %v1733_v15 = vpop.eup %1732 }
 0x98f   :  { %v1457_v16 = vadd.f32 1.0, %v1733_v15 }
 0x991   :  { %1734 = vrcp.f32 %v1457_v16 }
 0x99b   :  { %v1735_v9 = vpop.eup %1734 }
 0x99c   :  { %1461 = vst.msk [vmem:[%s2580_s7] sm:$0x3] %vm1460_vm1, %v1735_v9 }
 0x99d   :  { %1466 = vsyncpa [#allocation4], 1 }

</bundles_post_ra>
